<compile_context>
chip_gen: v7x
topology: tpu7x:2x2x1
jax: 0.10.0
libtpu: 0.0.40
codegen_flags: <defaults>
</compile_context>

<pallas_src>
import functools

import jax
import jax.numpy as jnp
from jax.experimental import pallas as pl
from jax.experimental.pallas import tpu as pltpu


def _fr_classifier_kernel(x_ref, w_ref, b_ref, o_ref, acc_ref, *, inv_hw):
    # x_ref  : (TILE_N, TILE_HW, C_pad)  input dtype (f32 / bf16)
    # w_ref  : (C_pad, NC_PAD)           f32, resident across all grid steps
    # b_ref  : (1, NC_PAD)               f32, resident
    # o_ref  : (TILE_N, NC_PAD)          f32, written once per N tile (last HW step)
    # acc_ref: (TILE_N, C_pad)           f32 scratch: running pooling sum
    k = pl.program_id(1)

    @pl.when(k == 0)
    def _():
        acc_ref[...] = jnp.zeros_like(acc_ref)

    # Global-average-pool partial sum: reduce the sublane (HW) axis; C stays on the lanes.
    x = x_ref[...].astype(jnp.float32)            # (TILE_N, TILE_HW, C_pad)
    acc_ref[...] += jnp.sum(x, axis=1)            # (TILE_N, C_pad), lane-dense in C

    @pl.when(k == pl.num_programs(1) - 1)
    def _():
        pooled = acc_ref[...] * inv_hw            # mean over the true H*W
        y = jnp.dot(pooled, w_ref[...], preferred_element_type=jnp.float32)
        o_ref[...] = (y + b_ref[...]).astype(o_ref.dtype)


def fr_model_classifier(feature_nchw, weight, bias):
    """feature_nchw: (N, C, H, W); weight: (numclass, C) torch-style; bias: (numclass,)."""
    N, C, H, W = feature_nchw.shape
    numclass, c_in = weight.shape
    assert c_in == C, "Linear in_features must match channel count"
    HW = H * W

    # ---- layout: NCHW -> (N, HW, C); channels (2048) land on the lane axis ----
    x = jnp.transpose(feature_nchw.reshape(N, C, HW), (0, 2, 1))      # (N, HW, C)

    # ---- pad to TPU-friendly multiples (zero padding is exact for sum / matmul) ----
    C_pad = pl.cdiv(C, 128) * 128
    NC_PAD = pl.cdiv(numclass, 128) * 128

    if N < 8:
        TILE_N, N_pad = N, N                      # block == full dim, no wasted HBM reads
    else:
        TILE_N = 8
        N_pad = pl.cdiv(N, TILE_N) * TILE_N

    # x tile <= ~4 MiB: large enough for HBM roofline, small enough to double-buffer
    # inside the default scoped-VMEM limit on all generations (incl. v7x's 64 MiB VMEM).
    itemsize = jnp.dtype(x.dtype).itemsize
    hw_budget = max(8, (4 * 1024 * 1024) // (itemsize * C_pad * TILE_N))
    hw_budget = max(8, (hw_budget // 8) * 8)                          # multiple of 8 sublanes
    TILE_HW = min(hw_budget, pl.cdiv(HW, 8) * 8)
    HW_pad = pl.cdiv(HW, TILE_HW) * TILE_HW

    x = jnp.pad(x, ((0, N_pad - N), (0, HW_pad - HW), (0, C_pad - C)))

    w = jnp.zeros((C_pad, NC_PAD), jnp.float32).at[:C, :numclass].set(
        jnp.transpose(weight).astype(jnp.float32))
    b = jnp.zeros((1, NC_PAD), jnp.float32).at[0, :numclass].set(bias.astype(jnp.float32))

    grid = (N_pad // TILE_N, HW_pad // TILE_HW)

    out = pl.pallas_call(
        functools.partial(_fr_classifier_kernel, inv_hw=1.0 / HW),
        out_shape=jax.ShapeDtypeStruct((N_pad, NC_PAD), jnp.float32),
        grid_spec=pltpu.PrefetchScalarGridSpec(
            num_scalar_prefetch=0,
            grid=grid,
            in_specs=[
                pl.BlockSpec((TILE_N, TILE_HW, C_pad), lambda i, k: (i, k, 0)),
                pl.BlockSpec((C_pad, NC_PAD), lambda i, k: (0, 0)),   # resident weight
                pl.BlockSpec((1, NC_PAD), lambda i, k: (0, 0)),       # resident bias
            ],
            out_specs=pl.BlockSpec((TILE_N, NC_PAD), lambda i, k: (i, 0)),
            scratch_shapes=[pltpu.VMEM((TILE_N, C_pad), jnp.float32)],
        ),
        compiler_params=pltpu.CompilerParams(
            dimension_semantics=("parallel", "arbitrary"),
        ),
    )(x, w, b)

    return out[:N, :numclass]


if __name__ == "__main__":
    key = jax.random.PRNGKey(0)
    k_x, k_w, k_b = jax.random.split(key, 3)

    # Module hard-codes Linear(2048, numclass) -> channels must be 2048.
    N, C, H, W = 2, 2048, 8, 8
    numclass = 16

    feature = jax.random.normal(k_x, (N, C, H, W), dtype=jnp.float32)
    # Deterministic synthetic parameters (same shapes as nn.Linear(2048, numclass)).
    weight = jax.random.normal(k_w, (numclass, C), dtype=jnp.float32) * 0.02
    bias = jax.random.normal(k_b, (numclass,), dtype=jnp.float32) * 0.01

    y = fr_model_classifier(feature, weight, bias)
    jax.block_until_ready(y)

    # Reference check in plain JAX (same semantics as the torch forward).
    pooled_ref = jnp.mean(feature.reshape(N, C, -1), axis=-1)
    y_ref = pooled_ref @ weight.T + bias
    assert y.shape == (N, numclass)
    assert jnp.allclose(y, y_ref, atol=1e-4, rtol=1e-4), float(jnp.max(jnp.abs(y - y_ref)))

    print("KERNEL_OK")
</pallas_src>

<mosaic_0001>
module attributes {stable_mosaic.version = 11 : i64} {
  func.func @_fr_classifier_kernel(%arg0: i32, %arg1: i32, %arg2: memref<2x64x2048xf32, #tpu.memory_space<vmem>>, %arg3: memref<2048x128xf32, #tpu.memory_space<vmem>>, %arg4: memref<1x128xf32, #tpu.memory_space<vmem>>, %arg5: memref<2x128xf32, #tpu.memory_space<vmem>>, %arg6: memref<2x2048xf32, #tpu.memory_space<vmem>>) attributes {dimension_semantics = [#tpu.dimension_semantics<parallel>, #tpu.dimension_semantics<arbitrary>], iteration_bounds = array<i64: 1, 1>, scalar_prefetch = 0 : i64, scratch_operands = 1 : i64, tpu.core_type = #tpu.core_type<tc>, window_params = [{transform_indices = @transform_0, window_bounds = array<i64: 2, 64, 2048>}, {pipeline_mode = #tpu.pipeline_mode<synchronous>, transform_indices = @transform_1, window_bounds = array<i64: 2048, 128>}, {pipeline_mode = #tpu.pipeline_mode<synchronous>, transform_indices = @transform_2, window_bounds = array<i64: 1, 128>}, {transform_indices = @transform_3, window_bounds = array<i64: 2, 128>}]} {
    %c0_i32 = arith.constant 0 : i32
    %0 = arith.cmpi eq, %arg1, %c0_i32 : i32
    %1 = arith.extui %0 : i1 to i32
    %c0_i32_0 = arith.constant 0 : i32
    %2 = arith.cmpi ne, %1, %c0_i32_0 : i32
    scf.if %2 {
      %cst_9 = arith.constant 0.000000e+00 : f32
      %11 = vector.broadcast %cst_9 : f32 to vector<2x2048xf32>
      %c0_10 = arith.constant 0 : index
      %c0_11 = arith.constant 0 : index
      %12 = vector.load %arg6[%c0_10, %c0_11] : memref<2x2048xf32, #tpu.memory_space<vmem>>, vector<2x2048xf32>
      tpu.vector_store %arg6[%c0_10, %c0_11], %11 {strides = array<i32>} : memref<2x2048xf32, #tpu.memory_space<vmem>>, vector<2x2048xf32>,
    } else {
    }
    %c0 = arith.constant 0 : index
    %c0_1 = arith.constant 0 : index
    %c0_2 = arith.constant 0 : index
    %3 = vector.load %arg2[%c0, %c0_1, %c0_2] : memref<2x64x2048xf32, #tpu.memory_space<vmem>>, vector<2x64x2048xf32>
    %c0_3 = arith.constant 0 : index
    %c0_4 = arith.constant 0 : index
    %4 = vector.load %arg6[%c0_3, %c0_4] : memref<2x2048xf32, #tpu.memory_space<vmem>>, vector<2x2048xf32>
    %cst = arith.constant dense<0.000000e+00> : vector<2x2048xf32>
    %5 = vector.multi_reduction <add>, %3, %cst [1] : vector<2x64x2048xf32> to vector<2x2048xf32>
    %6 = arith.addf %4, %5 : vector<2x2048xf32>
    %c0_5 = arith.constant 0 : index
    %c0_6 = arith.constant 0 : index
    %7 = vector.load %arg6[%c0_5, %c0_6] : memref<2x2048xf32, #tpu.memory_space<vmem>>, vector<2x2048xf32>
    tpu.vector_store %arg6[%c0_5, %c0_6], %6 {strides = array<i32>} : memref<2x2048xf32, #tpu.memory_space<vmem>>, vector<2x2048xf32>,
    %c0_i32_7 = arith.constant 0 : i32
    %8 = arith.cmpi eq, %arg1, %c0_i32_7 : i32
    %9 = arith.extui %8 : i1 to i32
    %c0_i32_8 = arith.constant 0 : i32
    %10 = arith.cmpi ne, %9, %c0_i32_8 : i32
    scf.if %10 {
      %c0_9 = arith.constant 0 : index
      %c0_10 = arith.constant 0 : index
      %11 = vector.load %arg6[%c0_9, %c0_10] : memref<2x2048xf32, #tpu.memory_space<vmem>>, vector<2x2048xf32>
      %cst_11 = arith.constant 1.562500e-02 : f32
      %12 = vector.broadcast %cst_11 : f32 to vector<2x2048xf32>
      %13 = arith.mulf %11, %12 : vector<2x2048xf32>
      %c0_12 = arith.constant 0 : index
      %c0_13 = arith.constant 0 : index
      %14 = vector.load %arg3[%c0_12, %c0_13] : memref<2048x128xf32, #tpu.memory_space<vmem>>, vector<2048x128xf32>
      %cst_14 = arith.constant dense<0.000000e+00> : vector<2x128xf32>
      %15 = tpu.matmul %13, %14, %cst_14 {dimension_numbers = #tpu.dot_dimension_numbers<[1], [0], [0], [1], [0, 0, 1, 1], [], []>} : vector<2x2048xf32>, vector<2048x128xf32>, vector<2x128xf32> -> vector<2x128xf32>
      %c0_15 = arith.constant 0 : index
      %c0_16 = arith.constant 0 : index
      %16 = vector.load %arg4[%c0_15, %c0_16] : memref<1x128xf32, #tpu.memory_space<vmem>>, vector<1x128xf32>
      %17 = vector.broadcast %16 : vector<1x128xf32> to vector<2x128xf32>
      %18 = arith.addf %15, %17 : vector<2x128xf32>
      %c0_17 = arith.constant 0 : index
      %c0_18 = arith.constant 0 : index
      %19 = vector.load %arg5[%c0_17, %c0_18] : memref<2x128xf32, #tpu.memory_space<vmem>>, vector<2x128xf32>
      tpu.vector_store %arg5[%c0_17, %c0_18], %18 {strides = array<i32>} : memref<2x128xf32, #tpu.memory_space<vmem>>, vector<2x128xf32>,
    } else {
    }
    return
  }
  func.func @transform_0(%arg0: i32, %arg1: i32) -> (i32, i32, i32) {
    %c0_i32 = arith.constant 0 : i32
    %c0_i32_0 = arith.constant 0 : i32
    return %arg0, %arg1, %c0_i32 : i32, i32, i32
  }
  func.func @transform_1(%arg0: i32, %arg1: i32) -> (i32, i32) {
    %c0_i32 = arith.constant 0 : i32
    %c0_i32_0 = arith.constant 0 : i32
    %c0_i32_1 = arith.constant 0 : i32
    return %c0_i32, %c0_i32_0 : i32, i32
  }
  func.func @transform_2(%arg0: i32, %arg1: i32) -> (i32, i32) {
    %c0_i32 = arith.constant 0 : i32
    %c0_i32_0 = arith.constant 0 : i32
    %c0_i32_1 = arith.constant 0 : i32
    return %c0_i32, %c0_i32_0 : i32, i32
  }
  func.func @transform_3(%arg0: i32, %arg1: i32) -> (i32, i32) {
    %c0_i32 = arith.constant 0 : i32
    %c0_i32_0 = arith.constant 0 : i32
    return %arg0, %c0_i32 : i32, i32
  }
}

</mosaic_0001>

<bundles_post_ra>
// kernel: tpu_custom_call.1
= control target key start
LH: loop header
LB: loop body
LE: loop exit
PB: predicated region body
PF: predicated region fallthrough
CT: control target
= control target key end

     0   :  { %8 = vsyncpa [#allocation4], 0  ;;  %s2962_s0 = inlined_call_operand.hbm [shape: f32[2,64,2048], index: 0, kind: input, shape index: {}]   ;;  %s2963_s1 = inlined_call_operand.hbm [shape: f32[2048,128], index: 1, kind: input, shape index: {}]   ;;  %s2964_s2 = inlined_call_operand.vmem [shape: f32[1,128], index: 2, kind: input, shape index: {}]   ;;  %s2965_s3 = inlined_call_operand.hbm [shape: f32[2,128], index: 3, kind: output, shape index: {}]  }
   0x1   :  { %9 = vsyncpa [#allocation7], 0 }
   0x2   :  { %10 = vsyncpa [#allocation5], 0  ;;  %s2496_s12 = smov [#allocation3]   ;;  %s2424_s16 = scalar_lea.hbm %s2962_s0, 32768 }
   0x3   :  { %s16_s13 = sshll.u32 %s2496_s12, 4  ;;  %p2425_p0 = scmp.ne.s32.totalorder %s2962_s0, %s2424_s16  ;;  %s17_s13 = int_to_ptr.vmem [resolvable:$true] %s16_s13 }
   0x4   :  { %p2428_p1 = scmp.lt.u32.totalorder %s2424_s16, %s2962_s0 }
   0x6   :  { %p2430_p2 = pnand %p2428_p1, %p2425_p0 }
   0x8   :  { %2433 = shalt.err (!%p2430_p2)
}
   0x9   :  { %s2434_s21 = scalar_lea.vmem %s17_s13, 32768  ;;  %p2439_p4 = scmp.lt.s32.totalorder %s17_s13, %s17_s13 }
   0xa   :  { %p2435_p3 = scmp.ne.s32.totalorder %s17_s13, %s2434_s21  ;;  %p2440_p5 = scmp.lt.s32.totalorder %s2434_s21, %s2434_s21 }
   0xc   :  { %p2441_p6 = por %p2440_p5, %p2439_p4 }
   0xe   :  { %p2442_p7 = pnand %p2441_p6, %p2435_p3 }
  0x10   :  { %2445 = shalt.err (!%p2442_p7)
}
  0x11   :  { %s2497_s22 = smov 2048   ;;  %s2498_s23 = smov 128  }
  0x12   :  { %22 = dma.hbm_to_vmem [thread:$0]  %s2962_s0, 32768, %s17_s13, [#allocation4], %s2497_s22, %s2497_s22, %s2498_s23  }
  0x13   :  { %s2499_s26 = smov [#allocation6]   ;;  %s2446_s30 = scalar_lea.hbm %s2963_s1, 32768 }
  0x14   :  { %s28_s27 = sshll.u32 %s2499_s26, 4  ;;  %p2447_p8 = scmp.ne.s32.totalorder %s2963_s1, %s2446_s30  ;;  %s29_s27 = int_to_ptr.vmem [resolvable:$true] %s28_s27 }
  0x15   :  { %p2450_p9 = scmp.lt.u32.totalorder %s2446_s30, %s2963_s1 }
  0x17   :  { %p2452_p10 = pnand %p2450_p9, %p2447_p8 }
  0x19   :  { %2455 = shalt.err (!%p2452_p10)
}
  0x1a   :  { %s2456_s8 = scalar_lea.vmem %s29_s27, 32768  ;;  %p2461_p12 = scmp.lt.s32.totalorder %s29_s27, %s29_s27 }
  0x1b   :  { %p2457_p11 = scmp.ne.s32.totalorder %s29_s27, %s2456_s8  ;;  %p2462_p13 = scmp.lt.s32.totalorder %s2456_s8, %s2456_s8 }
  0x1d   :  { %p2463_p0 = por %p2462_p13, %p2461_p12 }
  0x1f   :  { %p2464_p1 = pnand %p2463_p0, %p2457_p11 }
  0x21   :  { %2467 = shalt.err (!%p2464_p1)
}
  0x22   :  { %s2500_s0 = smov 8  }
  0x23   :  { %34 = dma.hbm_to_vmem [thread:$0]  %s2963_s1, 32768, %s29_s27, [#allocation7], %s2498_s23, %s2498_s23, %s2500_s0  }
  0x24   :  { %2490 = dma.done.wait [#allocation4], 32768  }
  0x25   :  { %2491 = vsyncadd [#allocation4], 4294934528 }
  0x26   :  { %2492 = dma.done.wait [#allocation7], 32768  }
  0x27   :  { %2493 = vsyncadd [#allocation7], 4294934528  ;;  %v968_v0 = vld [vmem:[#allocation6 + $0x80] sm:$0xff]  ;;  %v969_v1 = vld [vmem:[#allocation6 + $0x88] sm:$0xff]  ;;  %vm900_vm0 = vcmask 1041409   ;;  %vm902_vm1 = vcmask 1043459  }
  0x28   :  { %v952_v2 = vld [vmem:[#allocation6] sm:$0xff]  ;;  %v2161_v3 = vpack.c.bf16 %v969_v1, %v968_v0  ;;  %v953_v4 = vld [vmem:[#allocation6 + $0x8] sm:$0xff]  ;;  %v970_v11 = vld [vmem:[#allocation6 + $0x90] sm:$0xff]  ;;  %vm904_vm2 = vcmask 1045509   ;;  %vm906_vm3 = vcmask 1047559  }
  0x29   :  { %v1000_v5 = vld [vmem:[#allocation6 + $0x180] sm:$0xff]  ;;  %v1001_v6 = vld [vmem:[#allocation6 + $0x188] sm:$0xff]  ;;  %v2163_v7 = vpack.c.bf16 %v953_v4, %v952_v2  ;;  %v971_v13 = vld [vmem:[#allocation6 + $0x98] sm:$0xff] }
  0x2a   :  { %v2193_v8 = vpack.c.bf16 %v1001_v6, %v1000_v5  ;;  %v984_v9 = vld [vmem:[#allocation6 + $0x100] sm:$0xff]  ;;  %v985_v10 = vld [vmem:[#allocation6 + $0x108] sm:$0xff]  ;;  %2162 = vmatprep.subr.bf16.mxu0 %v2161_v3  ;;  %v954_v14 = vld [vmem:[#allocation6 + $0x10] sm:$0xff]  ;;  %v2165_v16 = vpack.c.bf16 %v971_v13, %v970_v11 }
  0x2b   :  { %v2195_v12 = vpack.c.bf16 %v985_v10, %v984_v9  ;;  %v955_v15 = vld [vmem:[#allocation6 + $0x18] sm:$0xff]  ;;  %2164 = vmatpush3.bf16.msra.mxu0 %v2163_v7  ;;  %v1002_v18 = vld [vmem:[#allocation6 + $0x190] sm:$0xff]  ;;  %v972_v23 = vld [vmem:[#allocation6 + $0xa0] sm:$0xff] }
  0x2c   :  { %2194 = vmatprep.subr.bf16.mxu1 %v2193_v8  ;;  %v2167_v17 = vpack.c.bf16 %v955_v15, %v954_v14  ;;  %v1003_v19 = vld [vmem:[#allocation6 + $0x198] sm:$0xff]  ;;  %v986_v20 = vld [vmem:[#allocation6 + $0x110] sm:$0xff]  ;;  %v973_v24 = vld [vmem:[#allocation6 + $0xa8] sm:$0xff]  ;;  %2166 = vmatprep.subr.bf16.mxu0 %v2165_v16 }
  0x2d   :  { %2196 = vmatpush3.bf16.msra.mxu1 %v2195_v12  ;;  %v2197_v21 = vpack.c.bf16 %v1003_v19, %v1002_v18  ;;  %v987_v22 = vld [vmem:[#allocation6 + $0x118] sm:$0xff]  ;;  %v2169_v26 = vpack.c.bf16 %v973_v24, %v972_v23  ;;  %v956_v27 = vld [vmem:[#allocation6 + $0x20] sm:$0xff]  ;;  %v957_v28 = vld [vmem:[#allocation6 + $0x28] sm:$0xff] }
  0x2e   :  { %v2199_v25 = vpack.c.bf16 %v987_v22, %v986_v20  ;;  %v1004_v29 = vld [vmem:[#allocation6 + $0x1a0] sm:$0xff]  ;;  %v1005_v30 = vld [vmem:[#allocation6 + $0x1a8] sm:$0xff]  ;;  %v2171_v33 = vpack.c.bf16 %v957_v28, %v956_v27  ;;  %v974_v35 = vld [vmem:[#allocation6 + $0xb0] sm:$0xff] }
  0x2f   :  { %2198 = vmatprep.subr.bf16.mxu1 %v2197_v21  ;;  %v988_v31 = vld [vmem:[#allocation6 + $0x120] sm:$0xff]  ;;  %v989_v32 = vld [vmem:[#allocation6 + $0x128] sm:$0xff]  ;;  %2168 = vmatpush3.bf16.msra.mxu0 %v2167_v17  ;;  %v2201_v34 = vpack.c.bf16 %v1005_v30, %v1004_v29  ;;  %v975_v36 = vld [vmem:[#allocation6 + $0xb8] sm:$0xff] }
  0x30   :  { %v958_v37 = vld [vmem:[#allocation6 + $0x30] sm:$0xff]  ;;  %2170 = vmatprep.subr.bf16.mxu0 %v2169_v26  ;;  %v2203_v38 = vpack.c.bf16 %v989_v32, %v988_v31  ;;  %v2173_v39 = vpack.c.bf16 %v975_v36, %v974_v35  ;;  %v959_v40 = vld [vmem:[#allocation6 + $0x38] sm:$0xff]  ;;  %v976_v46 = vld [vmem:[#allocation6 + $0xc0] sm:$0xff] }
  0x31   :  { %2200 = vmatpush3.bf16.msra.mxu1 %v2199_v25  ;;  %v1006_v41 = vld [vmem:[#allocation6 + $0x1b0] sm:$0xff]  ;;  %v1007_v42 = vld [vmem:[#allocation6 + $0x1b8] sm:$0xff]  ;;  %v977_v47 = vld [vmem:[#allocation6 + $0xc8] sm:$0xff]  ;;  %v2175_v48 = vpack.c.bf16 %v959_v40, %v958_v37 }
  0x32   :  { %2202 = vmatprep.subr.bf16.mxu1 %v2201_v34  ;;  %v2205_v43 = vpack.c.bf16 %v1007_v42, %v1006_v41  ;;  %v990_v44 = vld [vmem:[#allocation6 + $0x130] sm:$0xff]  ;;  %v991_v45 = vld [vmem:[#allocation6 + $0x138] sm:$0xff]  ;;  %v1008_v49 = vld [vmem:[#allocation6 + $0x1c0] sm:$0xff]  ;;  %v2177_v52 = vpack.c.bf16 %v977_v47, %v976_v46 }
  0x33   :  { %2172 = vmatpush3.bf16.msra.mxu0 %v2171_v33  ;;  %v1009_v50 = vld [vmem:[#allocation6 + $0x1c8] sm:$0xff]  ;;  %v2207_v51 = vpack.c.bf16 %v991_v45, %v990_v44  ;;  %v960_v53 = vld [vmem:[#allocation6 + $0x40] sm:$0xff]  ;;  %v978_v58 = vld [vmem:[#allocation6 + $0xd0] sm:$0xff] }
  0x34   :  { %2174 = vmatprep.subr.bf16.mxu0 %v2173_v39  ;;  %v961_v54 = vld [vmem:[#allocation6 + $0x48] sm:$0xff]  ;;  %v992_v55 = vld [vmem:[#allocation6 + $0x140] sm:$0xff]  ;;  %v2209_v56 = vpack.c.bf16 %v1009_v50, %v1008_v49  ;;  %v979_v59 = vld [vmem:[#allocation6 + $0xd8] sm:$0xff] }
  0x35   :  { %2204 = vmatpush3.bf16.msra.mxu1 %v2203_v38  ;;  %v993_v57 = vld [vmem:[#allocation6 + $0x148] sm:$0xff]  ;;  %v1010_v60 = vld [vmem:[#allocation6 + $0x1d0] sm:$0xff]  ;;  %v1011_v61 = vld [vmem:[#allocation6 + $0x1d8] sm:$0xff]  ;;  %v2179_v62 = vpack.c.bf16 %v961_v54, %v960_v53  ;;  %v2181_v0 = vpack.c.bf16 %v979_v59, %v978_v58 }
  0x36   :  { %2206 = vmatprep.subr.bf16.mxu1 %v2205_v43  ;;  %v2211_v63 = vpack.c.bf16 %v993_v57, %v992_v55  ;;  %v962_v1 = vld [vmem:[#allocation6 + $0x50] sm:$0xff]  ;;  %v963_v2 = vld [vmem:[#allocation6 + $0x58] sm:$0xff]  ;;  %v2213_v4 = vpack.c.bf16 %v1011_v61, %v1010_v60  ;;  %v980_v6 = vld [vmem:[#allocation6 + $0xe0] sm:$0xff] }
  0x37   :  { %2176 = vmatpush3.bf16.msra.mxu0 %v2175_v48  ;;  %v994_v3 = vld [vmem:[#allocation6 + $0x150] sm:$0xff]  ;;  %v995_v5 = vld [vmem:[#allocation6 + $0x158] sm:$0xff]  ;;  %v981_v7 = vld [vmem:[#allocation6 + $0xe8] sm:$0xff]  ;;  %v2183_v12 = vpack.c.bf16 %v963_v2, %v962_v1 }
  0x38   :  { %2178 = vmatprep.subr.bf16.mxu0 %v2177_v52  ;;  %v964_v8 = vld [vmem:[#allocation6 + $0x60] sm:$0xff]  ;;  %v965_v9 = vld [vmem:[#allocation6 + $0x68] sm:$0xff]  ;;  %v982_v15 = vld [vmem:[#allocation6 + $0xf0] sm:$0xff]  ;;  %v2215_v17 = vpack.c.bf16 %v995_v5, %v994_v3  ;;  %v2185_v18 = vpack.c.bf16 %v981_v7, %v980_v6 }
  0x39   :  { %2208 = vmatpush3.bf16.msra.mxu1 %v2207_v51  ;;  %v1012_v10 = vld [vmem:[#allocation6 + $0x1e0] sm:$0xff]  ;;  %v1013_v11 = vld [vmem:[#allocation6 + $0x1e8] sm:$0xff]  ;;  %v983_v16 = vld [vmem:[#allocation6 + $0xf8] sm:$0xff]  ;;  %v2187_v33 = vpack.c.bf16 %v965_v9, %v964_v8 }
  0x3a   :  { %2210 = vmatprep.subr.bf16.mxu1 %v2209_v56  ;;  %v996_v13 = vld [vmem:[#allocation6 + $0x160] sm:$0xff]  ;;  %v997_v14 = vld [vmem:[#allocation6 + $0x168] sm:$0xff]  ;;  %v1014_v19 = vld [vmem:[#allocation6 + $0x1f0] sm:$0xff]  ;;  %v2217_v23 = vpack.c.bf16 %v1013_v11, %v1012_v10  ;;  %v2189_v43 = vpack.c.bf16 %v983_v16, %v982_v15 }
  0x3b   :  { %2180 = vmatpush3.bf16.msra.mxu0 %v2179_v62  ;;  %v1015_v20 = vld [vmem:[#allocation6 + $0x1f8] sm:$0xff]  ;;  %v51_v21 = vld [vmem:[#allocation3] sm:$0xff]  ;;  %v52_v22 = vld [vmem:[#allocation3 + $0x8] sm:$0xff]  ;;  %v2219_v42 = vpack.c.bf16 %v997_v14, %v996_v13 }
  0x3c   :  { %2182 = vmatprep.subr.bf16.mxu0 %v2181_v0  ;;  %v53_v24 = vld [vmem:[#allocation3 + $0x10] sm:$0xff]  ;;  %v54_v25 = vld [vmem:[#allocation3 + $0x18] sm:$0xff]  ;;  %v67_v26 = vld [vmem:[#allocation3 + $0x80] sm:$0xff]  ;;  %v2221_v48 = vpack.c.bf16 %v1015_v20, %v1014_v19 }
  0x3d   :  { %2212 = vmatpush3.bf16.msra.mxu1 %v2211_v63  ;;  %v966_v27 = vld [vmem:[#allocation6 + $0x70] sm:$0xff]  ;;  %v967_v28 = vld [vmem:[#allocation6 + $0x78] sm:$0xff]  ;;  %v68_v29 = vld [vmem:[#allocation3 + $0x88] sm:$0xff]  ;;  %v311_v32 = vadd.f32 %v67_v26, %v51_v21 }
  0x3e   :  { %2214 = vmatprep.subr.bf16.mxu1 %v2213_v4  ;;  %v69_v30 = vld [vmem:[#allocation3 + $0x90] sm:$0xff]  ;;  %v70_v31 = vld [vmem:[#allocation3 + $0x98] sm:$0xff]  ;;  %v83_v36 = vld [vmem:[#allocation3 + $0x100] sm:$0xff]  ;;  %v324_v39 = vadd.f32 %v68_v29, %v52_v22  ;;  %v2191_v59 = vpack.c.bf16 %v967_v28, %v966_v27 }
  0x3f   :  { %2184 = vmatpush3.bf16.msra.mxu0 %v2183_v12  ;;  %v998_v34 = vld [vmem:[#allocation6 + $0x170] sm:$0xff]  ;;  %v999_v35 = vld [vmem:[#allocation6 + $0x178] sm:$0xff]  ;;  %v84_v37 = vld [vmem:[#allocation3 + $0x108] sm:$0xff]  ;;  %v337_v40 = vadd.f32 %v69_v30, %v53_v24  ;;  %v350_v41 = vadd.f32 %v70_v31, %v54_v25  ;;  %v312_v47 = vadd.f32 %v311_v32, %v83_v36 }
  0x40   :  { %v85_v38 = vld [vmem:[#allocation3 + $0x110] sm:$0xff]  ;;  %2186 = vmatprep.subr.bf16.mxu0 %v2185_v18  ;;  %v86_v44 = vld [vmem:[#allocation3 + $0x118] sm:$0xff]  ;;  %v99_v45 = vld [vmem:[#allocation3 + $0x180] sm:$0xff]  ;;  %v325_v52 = vadd.f32 %v324_v39, %v84_v37  ;;  %v2223_v2 = vpack.c.bf16 %v999_v35, %v998_v34 }
  0x41   :  { %2216 = vmatpush3.bf16.msra.mxu1 %v2215_v17  ;;  %v100_v46 = vld [vmem:[#allocation3 + $0x188] sm:$0xff]  ;;  %v101_v49 = vld [vmem:[#allocation3 + $0x190] sm:$0xff]  ;;  %v102_v50 = vld [vmem:[#allocation3 + $0x198] sm:$0xff]  ;;  %v338_v53 = vadd.f32 %v337_v40, %v85_v38  ;;  %v351_v54 = vadd.f32 %v350_v41, %v86_v44  ;;  %v313_v58 = vadd.f32 %v312_v47, %v99_v45 }
  0x42   :  { %2218 = vmatprep.subr.bf16.mxu1 %v2217_v23  ;;  %v115_v51 = vld [vmem:[#allocation3 + $0x200] sm:$0xff]  ;;  %v116_v55 = vld [vmem:[#allocation3 + $0x208] sm:$0xff]  ;;  %v117_v56 = vld [vmem:[#allocation3 + $0x210] sm:$0xff]  ;;  %v326_v63 = vadd.f32 %v325_v52, %v100_v46 }
  0x43   :  { %v118_v57 = vld [vmem:[#allocation3 + $0x218] sm:$0xff]  ;;  %2188 = vmatpush3.bf16.msra.mxu0 %v2187_v33  ;;  %v131_v60 = vld [vmem:[#allocation3 + $0x280] sm:$0xff]  ;;  %v132_v61 = vld [vmem:[#allocation3 + $0x288] sm:$0xff]  ;;  %v339_v0 = vadd.f32 %v338_v53, %v101_v49  ;;  %v352_v1 = vadd.f32 %v351_v54, %v102_v50  ;;  %v314_v6 = vadd.f32 %v313_v58, %v115_v51 }
  0x44   :  { %v133_v62 = vld [vmem:[#allocation3 + $0x290] sm:$0xff]  ;;  %2190 = vmatprep.subr.bf16.mxu0 %v2189_v43  ;;  %v134_v3 = vld [vmem:[#allocation3 + $0x298] sm:$0xff]  ;;  %v147_v4 = vld [vmem:[#allocation3 + $0x300] sm:$0xff]  ;;  %v327_v10 = vadd.f32 %v326_v63, %v116_v55 }
  0x45   :  { %2220 = vmatpush3.bf16.msra.mxu1 %v2219_v42  ;;  %v148_v5 = vld [vmem:[#allocation3 + $0x308] sm:$0xff]  ;;  %v149_v7 = vld [vmem:[#allocation3 + $0x310] sm:$0xff]  ;;  %v150_v8 = vld [vmem:[#allocation3 + $0x318] sm:$0xff]  ;;  %v340_v11 = vadd.f32 %v339_v0, %v117_v56  ;;  %v353_v12 = vadd.f32 %v352_v1, %v118_v57  ;;  %v315_v16 = vadd.f32 %v314_v6, %v131_v60 }
  0x46   :  { %2222 = vmatprep.subr.bf16.mxu1 %v2221_v48  ;;  %v163_v9 = vld [vmem:[#allocation3 + $0x380] sm:$0xff]  ;;  %v164_v13 = vld [vmem:[#allocation3 + $0x388] sm:$0xff]  ;;  %v165_v14 = vld [vmem:[#allocation3 + $0x390] sm:$0xff]  ;;  %v328_v20 = vadd.f32 %v327_v10, %v132_v61 }
  0x47   :  { %v166_v15 = vld [vmem:[#allocation3 + $0x398] sm:$0xff]  ;;  %2192 = vmatpush3.bf16.msra.mxu0 %v2191_v59  ;;  %v179_v17 = vld [vmem:[#allocation3 + $0x400] sm:$0xff]  ;;  %v180_v18 = vld [vmem:[#allocation3 + $0x408] sm:$0xff]  ;;  %v341_v21 = vadd.f32 %v340_v11, %v133_v62  ;;  %v354_v22 = vadd.f32 %v353_v12, %v134_v3  ;;  %v316_v26 = vadd.f32 %v315_v16, %v147_v4 }
  0x48   :  { %v181_v19 = vld [vmem:[#allocation3 + $0x410] sm:$0xff]  ;;  %v182_v23 = vld [vmem:[#allocation3 + $0x418] sm:$0xff]  ;;  %v195_v24 = vld [vmem:[#allocation3 + $0x480] sm:$0xff]  ;;  %v329_v30 = vadd.f32 %v328_v20, %v148_v5 }
  0x49   :  { %2224 = vmatpush3.bf16.msra.mxu1 %v2223_v2  ;;  %v196_v25 = vld [vmem:[#allocation3 + $0x488] sm:$0xff]  ;;  %v197_v27 = vld [vmem:[#allocation3 + $0x490] sm:$0xff]  ;;  %v198_v28 = vld [vmem:[#allocation3 + $0x498] sm:$0xff]  ;;  %v342_v31 = vadd.f32 %v341_v21, %v149_v7  ;;  %v355_v32 = vadd.f32 %v354_v22, %v150_v8  ;;  %v519_v33 = vadd.f32 %v195_v24, %v179_v17  ;;  %v317_v37 = vadd.f32 %v316_v26, %v163_v9 }
  0x4a   :  { %v211_v29 = vld [vmem:[#allocation3 + $0x500] sm:$0xff]  ;;  %v212_v34 = vld [vmem:[#allocation3 + $0x508] sm:$0xff]  ;;  %v213_v35 = vld [vmem:[#allocation3 + $0x510] sm:$0xff]  ;;  %v532_v38 = vadd.f32 %v196_v25, %v180_v18  ;;  %v545_v39 = vadd.f32 %v197_v27, %v181_v19  ;;  %v558_v40 = vadd.f32 %v198_v28, %v182_v23  ;;  %v330_v44 = vadd.f32 %v329_v30, %v164_v13 }
  0x4b   :  { %v214_v36 = vld [vmem:[#allocation3 + $0x518] sm:$0xff]  ;;  %v227_v41 = vld [vmem:[#allocation3 + $0x580] sm:$0xff]  ;;  %v228_v42 = vld [vmem:[#allocation3 + $0x588] sm:$0xff]  ;;  %v343_v45 = vadd.f32 %v342_v31, %v165_v14  ;;  %v356_v46 = vadd.f32 %v355_v32, %v166_v15  ;;  %v520_v47 = vadd.f32 %v519_v33, %v211_v29  ;;  %v318_v50 = vrot.slane %v317_v37, 4 }
  0x4c   :  { %v229_v43 = vld [vmem:[#allocation3 + $0x590] sm:$0xff]  ;;  %v230_v48 = vld [vmem:[#allocation3 + $0x598] sm:$0xff]  ;;  %v243_v49 = vld [vmem:[#allocation3 + $0x600] sm:$0xff]  ;;  %v533_v51 = vadd.f32 %v532_v38, %v212_v34  ;;  %v546_v52 = vadd.f32 %v545_v39, %v213_v35  ;;  %v559_v53 = vadd.f32 %v558_v40, %v214_v36  ;;  %v331_v57 = vrot.slane %v330_v44, 4 }
  0x4d   :  { %v244_v54 = vld [vmem:[#allocation3 + $0x608] sm:$0xff]  ;;  %v245_v55 = vld [vmem:[#allocation3 + $0x610] sm:$0xff]  ;;  %v246_v56 = vld [vmem:[#allocation3 + $0x618] sm:$0xff]  ;;  %v344_v58 = vrot.slane %v343_v45, 4  ;;  %v357_v59 = vrot.slane %v356_v46, 4  ;;  %v521_v60 = vadd.f32 %v520_v47, %v227_v41  ;;  %v319_v62 = vadd.f32 %v318_v50, %v317_v37 }
  0x4e   :  { %v259_v61 = vld [vmem:[#allocation3 + $0x680] sm:$0xff]  ;;  %v534_v63 = vadd.f32 %v533_v51, %v228_v42  ;;  %v547_v0 = vadd.f32 %v546_v52, %v229_v43  ;;  %v560_v1 = vadd.f32 %v559_v53, %v230_v48  ;;  %v260_v2 = vld [vmem:[#allocation3 + $0x688] sm:$0xff]  ;;  %v261_v3 = vld [vmem:[#allocation3 + $0x690] sm:$0xff]  ;;  %v332_v5 = vadd.f32 %v331_v57, %v330_v44 }
  0x4f   :  { %v262_v4 = vld [vmem:[#allocation3 + $0x698] sm:$0xff]  ;;  %v345_v6 = vadd.f32 %v344_v58, %v343_v45  ;;  %v358_v7 = vadd.f32 %v357_v59, %v356_v46  ;;  %v522_v8 = vadd.f32 %v521_v60, %v243_v49  ;;  %v275_v9 = vld [vmem:[#allocation3 + $0x700] sm:$0xff]  ;;  %v320_v10 = vrot.slane %v319_v62, 2  ;;  %v276_v14 = vld [vmem:[#allocation3 + $0x708] sm:$0xff] }
  0x50   :  { %v535_v11 = vadd.f32 %v534_v63, %v244_v54  ;;  %v548_v12 = vadd.f32 %v547_v0, %v245_v55  ;;  %v561_v13 = vadd.f32 %v560_v1, %v246_v56  ;;  %v277_v15 = vld [vmem:[#allocation3 + $0x710] sm:$0xff]  ;;  %v278_v16 = vld [vmem:[#allocation3 + $0x718] sm:$0xff]  ;;  %v333_v17 = vrot.slane %v332_v5, 2  ;;  %v291_v21 = vld [vmem:[#allocation3 + $0x780] sm:$0xff] }
  0x51   :  { %v346_v18 = vrot.slane %v345_v6, 2  ;;  %v359_v19 = vrot.slane %v358_v7, 2  ;;  %v523_v20 = vadd.f32 %v522_v8, %v259_v61  ;;  %v321_v22 = vadd.f32 %v320_v10, %v319_v62  ;;  %v292_v26 = vld [vmem:[#allocation3 + $0x788] sm:$0xff]  ;;  %v293_v27 = vld [vmem:[#allocation3 + $0x790] sm:$0xff]  ;;  %v294_v28 = vld [vmem:[#allocation3 + $0x798] sm:$0xff] }
  0x52   :  { %v536_v23 = vadd.f32 %v535_v11, %v260_v2  ;;  %v549_v24 = vadd.f32 %v548_v12, %v261_v3  ;;  %v562_v25 = vadd.f32 %v561_v13, %v262_v4  ;;  %v334_v29 = vadd.f32 %v333_v17, %v332_v5  ;;  %v1032_v37 = vld [vmem:[#allocation6 + $0x280] sm:$0xff]  ;;  %v1033_v38 = vld [vmem:[#allocation6 + $0x288] sm:$0xff] }
  0x53   :  { %v347_v30 = vadd.f32 %v346_v18, %v345_v6  ;;  %v360_v31 = vadd.f32 %v359_v19, %v358_v7  ;;  %v524_v32 = vadd.f32 %v523_v20, %v275_v9  ;;  %v322_v39 = vrot.slane %v321_v22, 1  ;;  %v1064_v47 = vld [vmem:[#allocation6 + $0x380] sm:$0xff]  ;;  %v1065_v48 = vld [vmem:[#allocation6 + $0x388] sm:$0xff] }
  0x54   :  { %v537_v33 = vadd.f32 %v536_v23, %v276_v14  ;;  %v550_v34 = vadd.f32 %v549_v24, %v277_v15  ;;  %v563_v35 = vadd.f32 %v562_v25, %v278_v16  ;;  %v335_v43 = vrot.slane %v334_v29, 1 }
  0x55   :  { %v525_v36 = vadd.f32 %v524_v32, %v291_v21  ;;  %v348_v44 = vrot.slane %v347_v30, 1  ;;  %v361_v45 = vrot.slane %v360_v31, 1  ;;  %v2225_v52 = vpack.c.bf16 %v1033_v38, %v1032_v37  ;;  %v71_v32 = vld [vmem:[#allocation3 + $0xa0] sm:$0xff]  ;;  %v74_v37 = vld [vmem:[#allocation3 + $0xb8] sm:$0xff] }
  0x56   :  { %v538_v40 = vadd.f32 %v537_v33, %v292_v26  ;;  %v551_v41 = vadd.f32 %v550_v34, %v293_v27  ;;  %v564_v42 = vadd.f32 %v563_v35, %v294_v28  ;;  %v2501_v54 = vmov 1983009808   ;;  %v55_v28 = vld [vmem:[#allocation3 + $0x20] sm:$0xff]  ;;  %v72_v35 = vld [vmem:[#allocation3 + $0xa8] sm:$0xff] }
  0x57   :  { %v526_v46 = vrot.slane %v525_v36, 4  ;;  %v762_v55 = vunpack.c.l.s4 %v2501_v54  ;;  %v764_v56 = vlaneseq  ;;  %2226 = vmatprep.subr.bf16.mxu0 %v2225_v52  ;;  %v2257_v60 = vpack.c.bf16 %v1065_v48, %v1064_v47  ;;  %v103_v47 = vld [vmem:[#allocation3 + $0x1a0] sm:$0xff]  ;;  %v104_v48 = vld [vmem:[#allocation3 + $0x1a8] sm:$0xff]  ;;  %v105_v52 = vld [vmem:[#allocation3 + $0x1b0] sm:$0xff] }
  0x58   :  { %v539_v49 = vrot.slane %v538_v40, 4  ;;  %v552_v50 = vrot.slane %v551_v41, 4  ;;  %v565_v51 = vrot.slane %v564_v42, 4  ;;  %v323_v61 = vadd.f32 %v322_v39, %v321_v22  ;;  %v87_v39 = vld [vmem:[#allocation3 + $0x120] sm:$0xff] }
  0x59   :  { %v527_v53 = vadd.f32 %v526_v46, %v525_v36  ;;  %v336_v62 = vadd.f32 %v335_v43, %v334_v29  ;;  %v349_v63 = vadd.f32 %v348_v44, %v347_v30  ;;  %v362_v1 = vadd.f32 %v361_v45, %v360_v31  ;;  %2258 = vmatprep.subr.bf16.mxu1 %v2257_v60  ;;  %v56_v29 = vld [vmem:[#allocation3 + $0x28] sm:$0xff]  ;;  %v57_v30 = vld [vmem:[#allocation3 + $0x30] sm:$0xff]  ;;  %v58_v31 = vld [vmem:[#allocation3 + $0x38] sm:$0xff] }
  0x5a   :  { %v540_v57 = vadd.f32 %v539_v49, %v538_v40  ;;  %v553_v58 = vadd.f32 %v552_v50, %v551_v41  ;;  %v566_v59 = vadd.f32 %v565_v51, %v564_v42  ;;  %v765_v6 = vshrl.u32 %v764_v56, 7  ;;  %v73_v36 = vld [vmem:[#allocation3 + $0xb0] sm:$0xff]  ;;  %v88_v40 = vld [vmem:[#allocation3 + $0x128] sm:$0xff]  ;;  %v90_v46 = vld [vmem:[#allocation3 + $0x138] sm:$0xff] }
  0x5b   :  { %v528_v0 = vrot.slane %v527_v53, 2  ;;  %v763_v10 = vunpack.c.0.s8 %v762_v55  ;;  %v759_v12 = vcombine.low %v323_v61, %v336_v62  ;;  %v760_v16 = vcombine.low %v349_v63, %v362_v1  ;;  %v89_v41 = vld [vmem:[#allocation3 + $0x130] sm:$0xff]  ;;  %v2553_v50 = vld [vmem:[#allocation6 + $0x200] sm:$0xff]  ;;  %v2555_v51 = vld [vmem:[#allocation6 + $0x208] sm:$0xff] }
  0x5c   :  { %v541_v2 = vrot.slane %v540_v57, 2  ;;  %v554_v3 = vrot.slane %v553_v58, 2  ;;  %v567_v4 = vrot.slane %v566_v59, 2  ;;  %v363_v38 = vadd.f32 %v71_v32, %v55_v28  ;;  %v119_v54 = vld [vmem:[#allocation3 + $0x220] sm:$0xff]  ;;  %v2560_v60 = vld [vmem:[#allocation6 + $0x308] sm:$0xff]  ;;  %v121_v62 = vld [vmem:[#allocation3 + $0x230] sm:$0xff] }
  0x5d   :  { %v529_v5 = vadd.f32 %v528_v0, %v527_v53  ;;  %v2547_v21 = vsub.s32 %v763_v10, %v765_v6  ;;  %v376_v42 = vadd.f32 %v72_v35, %v56_v29  ;;  %v389_v43 = vadd.f32 %v73_v36, %v57_v30  ;;  %v106_v53 = vld [vmem:[#allocation3 + $0x1b8] sm:$0xff]  ;;  %v120_v61 = vld [vmem:[#allocation3 + $0x228] sm:$0xff]  ;;  %v137_v10 = vld [vmem:[#allocation3 + $0x2b0] sm:$0xff] }
  0x5e   :  { %v542_v7 = vadd.f32 %v541_v2, %v540_v57  ;;  %v555_v8 = vadd.f32 %v554_v3, %v553_v58  ;;  %v568_v9 = vadd.f32 %v567_v4, %v566_v59  ;;  %v402_v44 = vadd.f32 %v74_v37, %v58_v31  ;;  %v2558_v59 = vld [vmem:[#allocation6 + $0x300] sm:$0xff]  ;;  %v122_v63 = vld [vmem:[#allocation3 + $0x238] sm:$0xff]  ;;  %v2563_v2 = vld [vmem:[#allocation6 + $0x290] sm:$0xff] }
  0x5f   :  { %v530_v11 = vrot.slane %v529_v5, 1  ;;  %v767_v22 = vrot.slane %v759_v12, %v2547_v21  ;;  %v774_v23 = vrot.slane %v760_v16, %v2547_v21  ;;  %v364_v49 = vadd.f32 %v363_v38, %v87_v39  ;;  %v2565_v3 = vld [vmem:[#allocation6 + $0x298] sm:$0xff]  ;;  %v135_v4 = vld [vmem:[#allocation3 + $0x2a0] sm:$0xff]  ;;  %v153_v16 = vld [vmem:[#allocation3 + $0x330] sm:$0xff] }
  0x60   :  { %v543_v13 = vrot.slane %v542_v7, 1  ;;  %v556_v14 = vrot.slane %v555_v8, 1  ;;  %v569_v15 = vrot.slane %v568_v9, 1  ;;  %v377_v55 = vadd.f32 %v376_v42, %v88_v40  ;;  %v2573_v28 = vld [vmem:[#allocation6 + $0x390] sm:$0xff]  ;;  %v2575_v29 = vld [vmem:[#allocation6 + $0x398] sm:$0xff]  ;;  %v183_v31 = vld [vmem:[#allocation3 + $0x420] sm:$0xff] }
  0x61   :  { %v531_v17 = vadd.f32 %v530_v11, %v529_v5  ;;  %v775_v33 = vcombine.low %v767_v22, %v774_v23  ;;  %v390_v56 = vadd.f32 %v389_v43, %v89_v41  ;;  %v403_v57 = vadd.f32 %v402_v44, %v90_v46  ;;  %v138_v11 = vld [vmem:[#allocation3 + $0x2b8] sm:$0xff]  ;;  %v169_v30 = vld [vmem:[#allocation3 + $0x3b0] sm:$0xff]  ;;  %v184_v32 = vld [vmem:[#allocation3 + $0x428] sm:$0xff] }
  0x62   :  { %v544_v18 = vadd.f32 %v543_v13, %v542_v7  ;;  %v557_v19 = vadd.f32 %v556_v14, %v555_v8  ;;  %v570_v20 = vadd.f32 %v569_v15, %v568_v9  ;;  %v365_v0 = vadd.f32 %v364_v49, %v103_v47  ;;  %v136_v9 = vld [vmem:[#allocation3 + $0x2a8] sm:$0xff]  ;;  %v151_v14 = vld [vmem:[#allocation3 + $0x320] sm:$0xff]  ;;  %v154_v23 = vld [vmem:[#allocation3 + $0x338] sm:$0xff] }
  0x63   :  { %v378_v5 = vadd.f32 %v377_v55, %v104_v48  ;;  %v391_v6 = vadd.f32 %v390_v56, %v105_v52  ;;  %v404_v7 = vadd.f32 %v403_v57, %v106_v53  ;;  %v152_v15 = vld [vmem:[#allocation3 + $0x328] sm:$0xff]  ;;  %v2227_v22 = vpack.c.bf16 %v2555_v51, %v2553_v50  ;;  %v170_v39 = vld [vmem:[#allocation3 + $0x3b8] sm:$0xff]  ;;  %v199_v40 = vld [vmem:[#allocation3 + $0x4a0] sm:$0xff] }
  0x64   :  { %v827_v24 = vcombine.low %v531_v17, %v544_v18  ;;  %v828_v25 = vcombine.low %v557_v19, %v570_v20  ;;  %v366_v12 = vadd.f32 %v365_v0, %v119_v54  ;;  %v2229_v38 = vpack.c.bf16 %v2565_v3, %v2563_v2  ;;  %v200_v41 = vld [vmem:[#allocation3 + $0x4a8] sm:$0xff]  ;;  %v2580_v43 = vld [vmem:[#allocation6 + $0x210] sm:$0xff]  ;;  %v2582_v44 = vld [vmem:[#allocation6 + $0x218] sm:$0xff] }
  0x65   :  { %v379_v17 = vadd.f32 %v378_v5, %v120_v61  ;;  %v392_v18 = vadd.f32 %v391_v6, %v121_v62  ;;  %v405_v19 = vadd.f32 %v404_v7, %v122_v63  ;;  %v201_v46 = vld [vmem:[#allocation3 + $0x4b0] sm:$0xff]  ;;  %v215_v47 = vld [vmem:[#allocation3 + $0x520] sm:$0xff]  ;;  %v571_v53 = vadd.f32 %v199_v40, %v183_v31  ;;  %v2587_v57 = vld [vmem:[#allocation6 + $0x318] sm:$0xff] }
  0x66   :  { %v835_v26 = vrot.slane %v827_v24, %v2547_v21  ;;  %v842_v27 = vrot.slane %v828_v25, %v2547_v21  ;;  %v167_v24 = vld [vmem:[#allocation3 + $0x3a0] sm:$0xff]  ;;  %v168_v25 = vld [vmem:[#allocation3 + $0x3a8] sm:$0xff]  ;;  %v2585_v56 = vld [vmem:[#allocation6 + $0x310] sm:$0xff] }
  0x67   :  { %v406_v35 = vadd.f32 %v405_v19, %v138_v11  ;;  %v2591_v61 = vld [vmem:[#allocation6 + $0x2a8] sm:$0xff]  ;;  %v2593_v62 = vld [vmem:[#allocation6 + $0x220] sm:$0xff]  ;;  %v217_v2 = vld [vmem:[#allocation3 + $0x530] sm:$0xff] }
  0x68   :  { %v843_v34 = vcombine.low %v835_v26, %v842_v27  ;;  %v367_v26 = vadd.f32 %v366_v12, %v135_v4  ;;  %v2259_v27 = vpack.c.bf16 %v2560_v60, %v2558_v59  ;;  %v216_v63 = vld [vmem:[#allocation3 + $0x528] sm:$0xff]  ;;  %v231_v3 = vld [vmem:[#allocation3 + $0x5a0] sm:$0xff]  ;;  %v2616_v31 = vld [vmem:[#allocation6 + $0x230] sm:$0xff] }
  0x69   :  { %v407_v52 = vadd.f32 %v406_v35, %v154_v23  ;;  %v232_v4 = vld [vmem:[#allocation3 + $0x5a8] sm:$0xff]  ;;  %v2599_v12 = vld [vmem:[#allocation6 + $0x3a0] sm:$0xff]  ;;  %v2263_v35 = vpack.c.bf16 %v2587_v57, %v2585_v56 }
  0x6a   :  { %v899_v45 = vrot.slane %v843_v34, 7  ;;  %v393_v34 = vadd.f32 %v392_v18, %v137_v10  ;;  %v368_v42 = vadd.f32 %v367_v26, %v151_v14  ;;  %v2261_v10 = vpack.c.bf16 %v2575_v29, %v2573_v28  ;;  %v2597_v11 = vld [vmem:[#allocation6 + $0x228] sm:$0xff]  ;;  %v2608_v26 = vld [vmem:[#allocation6 + $0x320] sm:$0xff]  ;;  %v2612_v29 = vld [vmem:[#allocation6 + $0x2b0] sm:$0xff] }
  0x6b   :  { %v408_v7 = vadd.f32 %v407_v52, %v170_v39  ;;  %v248_v18 = vld [vmem:[#allocation3 + $0x628] sm:$0xff]  ;;  %v249_v39 = vld [vmem:[#allocation3 + $0x630] sm:$0xff]  ;;  %v263_v40 = vld [vmem:[#allocation3 + $0x6a0] sm:$0xff] }
  0x6c   :  { %v901_v58 = vsel %vm900_vm0, %v899_v45, %v775_v33  ;;  %v380_v33 = vadd.f32 %v379_v17, %v136_v9  ;;  %v394_v49 = vadd.f32 %v393_v34, %v153_v16  ;;  %v369_v0 = vadd.f32 %v368_v42, %v167_v24  ;;  %v233_v16 = vld [vmem:[#allocation3 + $0x5b0] sm:$0xff]  ;;  %v247_v17 = vld [vmem:[#allocation3 + $0x620] sm:$0xff]  ;;  %v2610_v28 = vld [vmem:[#allocation6 + $0x328] sm:$0xff] }
  0x6d   :  { %v903_v1 = vsel %vm902_vm1, %v899_v45, %v901_v58  ;;  %v2589_v58 = vld [vmem:[#allocation6 + $0x2a0] sm:$0xff]  ;;  %v202_v34 = vld [vmem:[#allocation3 + $0x4b8] sm:$0xff]  ;;  %v409_v50 = vrot.slane %v408_v7, 4  ;;  %v280_v52 = vld [vmem:[#allocation3 + $0x728] sm:$0xff] }
  0x6e   :  { %v905_v8 = vsel %vm904_vm2, %v899_v45, %v903_v1  ;;  %v381_v48 = vadd.f32 %v380_v33, %v152_v15  ;;  %v584_v1 = vadd.f32 %v200_v41, %v184_v32  ;;  %v395_v6 = vadd.f32 %v394_v49, %v169_v30  ;;  %v2614_v30 = vld [vmem:[#allocation6 + $0x2b8] sm:$0xff]  ;;  %v264_v41 = vld [vmem:[#allocation3 + $0x6a8] sm:$0xff]  ;;  %v279_v49 = vld [vmem:[#allocation3 + $0x720] sm:$0xff] }
  0x6f   :  { %v907_v13 = vsel %vm906_vm3, %v899_v45, %v905_v8  ;;  %v185_v45 = vld [vmem:[#allocation3 + $0x430] sm:$0xff]  ;;  %v572_v8 = vadd.f32 %v571_v53, %v215_v47  ;;  %v370_v19 = vrot.slane %v369_v0, 4  ;;  %v2618_v32 = vld [vmem:[#allocation6 + $0x238] sm:$0xff]  ;;  %v2645_v56 = vld [vmem:[#allocation6 + $0x2c0] sm:$0xff] }
  0x70   :  { %v948_v20 = vmul.f32 0.015625, %v907_v13  ;;  %v382_v5 = vadd.f32 %v381_v48, %v168_v25  ;;  %v2601_v13 = vld [vmem:[#allocation6 + $0x3a8] sm:$0xff]  ;;  %v585_v14 = vadd.f32 %v584_v1, %v216_v63  ;;  %v597_v15 = vadd.f32 %v201_v46, %v185_v45  ;;  %v186_v33 = vld [vmem:[#allocation3 + $0x438] sm:$0xff]  ;;  %v265_v48 = vld [vmem:[#allocation3 + $0x6b0] sm:$0xff] }
  0x71   :  { %v396_v23 = vrot.slane %v395_v6, 4  ;;  %v573_v24 = vadd.f32 %v572_v8, %v231_v3  ;;  %v2231_v25 = vpack.c.bf16 %v2582_v44, %v2580_v43  ;;  %v2265_v42 = vpack.c.bf16 %v2601_v13, %v2599_v12  ;;  %v2633_v43 = vld [vmem:[#allocation6 + $0x3b8] sm:$0xff]  ;;  %v2647_v57 = vld [vmem:[#allocation6 + $0x2c8] sm:$0xff] }
  0x72   :  { %v1226_v36 = vrot.slane %v948_v20, %v2547_v21  ;;  %v1219_v37 = vcombine.high %v948_v20, %v948_v20  ;;  %v383_v20 = vrot.slane %v382_v5, 4  ;;  %v586_v51 = vadd.f32 %v585_v14, %v232_v4  ;;  %v218_v44 = vld [vmem:[#allocation3 + $0x538] sm:$0xff]  ;;  %v281_v4 = vld [vmem:[#allocation3 + $0x730] sm:$0xff] }
  0x73   :  { %v574_v45 = vadd.f32 %v573_v24, %v247_v17  ;;  %v2635_v53 = vadd.f32 %v370_v19, %v369_v0  ;;  %v2639_v59 = vadd.f32 %v396_v23, %v395_v6  ;;  %v610_v60 = vadd.f32 %v202_v34, %v186_v33  ;;  %v296_v6 = vld [vmem:[#allocation3 + $0x7a8] sm:$0xff]  ;;  %v297_v17 = vld [vmem:[#allocation3 + $0x7b0] sm:$0xff]  ;;  %v2664_v24 = vld [vmem:[#allocation6 + $0x340] sm:$0xff] }
  0x74   :  { %v1234_v54 = vcombine.high %v1226_v36, %v1226_v36  ;;  %v1233_v55 = vrot.slane %v1219_v37, %v2547_v21  ;;  %v2235_v37 = vpack.c.bf16 %v2597_v11, %v2593_v62  ;;  %v587_v46 = vadd.f32 %v586_v51, %v248_v18  ;;  %v250_v11 = vld [vmem:[#allocation3 + $0x638] sm:$0xff]  ;;  %v1057_v34 = vld [vmem:[#allocation6 + $0x348] sm:$0xff] }
  0x75   :  { %v575_v62 = vadd.f32 %v574_v45, %v263_v40  ;;  %v2267_v1 = vpack.c.bf16 %v2610_v28, %v2608_v26  ;;  %v2239_v3 = vpack.c.bf16 %v2618_v32, %v2616_v31  ;;  %v611_v8 = vadd.f32 %v610_v60, %v218_v44  ;;  %v1043_v51 = vld [vmem:[#allocation6 + $0x2d8] sm:$0xff] }
  0x76   :  { %1367 = vmatprep.mubr.f32.mxu0 %v1234_v54  ;;  %v1235_v9 = vcombine.high %v1233_v55, %v1233_v55  ;;  %v2637_v54 = vadd.f32 %v383_v20, %v382_v5  ;;  %v588_v63 = vadd.f32 %v587_v46, %v264_v41  ;;  %v295_v5 = vld [vmem:[#allocation3 + $0x7a0] sm:$0xff]  ;;  %v372_v18 = vrot.slane %v2635_v53, 2 }
  0x77   :  { %1368 = vmatmul.mubr.f32.vlgmr.msra.gmra.mrb[0].mxu0 %v1226_v36  ;;  %v2233_v36 = vpack.c.bf16 %v2591_v61, %v2589_v58  ;;  %v234_v58 = vld [vmem:[#allocation3 + $0x5b8] sm:$0xff]  ;;  %v410_v61 = vadd.f32 %v409_v50, %v408_v7  ;;  %v576_v12 = vadd.f32 %v575_v62, %v279_v49  ;;  %v398_v20 = vrot.slane %v2639_v59, 2  ;;  %v1042_v50 = vld [vmem:[#allocation6 + $0x2d0] sm:$0xff] }
  0x78   :  { %2228 = vmatpush3.bf16.msra.mxu0 %v2227_v22  ;;  %1437 = vmatprep.mubr.f32.mxu1 %v1235_v9  ;;  %v598_v22 = vadd.f32 %v597_v15, %v217_v2  ;;  %v2237_v2 = vpack.c.bf16 %v2614_v30, %v2612_v29  ;;  %v2657_v9 = vld [vmem:[#allocation6 + $0x240] sm:$0xff]  ;;  %v589_v13 = vadd.f32 %v588_v63, %v280_v52  ;;  %v385_v19 = vrot.slane %v2637_v54, 2  ;;  %v1059_v62 = vld [vmem:[#allocation6 + $0x358] sm:$0xff]  ;;  %v1045_v63 = vld [vmem:[#allocation6 + $0x2e8] sm:$0xff] }
  0x79   :  { %1438 = vmatmul.mubr.f32.vlgmr.msra.gmra.mrb[0].mxu1 %v1233_v55  ;;  %2230 = vmatprep.subr.bf16.mxu0 %v2229_v38  ;;  %v2631_v38 = vld [vmem:[#allocation6 + $0x3b0] sm:$0xff]  ;;  %v2643_v55 = vld [vmem:[#allocation6 + $0x338] sm:$0xff]  ;;  %v1072_v15 = vld [vmem:[#allocation6 + $0x3c0] sm:$0xff]  ;;  %v612_v23 = vadd.f32 %v611_v8, %v234_v58  ;;  %v411_v26 = vrot.slane %v410_v61, 2  ;;  %v577_v28 = vadd.f32 %v576_v12, %v295_v5  ;;  %v2241_v32 = vpack.c.bf16 %v2647_v57, %v2645_v56 }
  0x7a   :  { %2260 = vmatpush3.bf16.msra.mxu1 %v2259_v27  ;;  %v599_v47 = vadd.f32 %v598_v22, %v233_v16  ;;  %v2641_v27 = vld [vmem:[#allocation6 + $0x330] sm:$0xff]  ;;  %v2269_v7 = vpack.c.bf16 %v2633_v43, %v2631_v38  ;;  %v1073_v16 = vld [vmem:[#allocation6 + $0x3c8] sm:$0xff]  ;;  %v590_v29 = vadd.f32 %v589_v13, %v296_v6  ;;  %v1075_v43 = vld [vmem:[#allocation6 + $0x3d8] sm:$0xff]  ;;  %v373_v44 = vadd.f32 %v372_v18, %v2635_v53 }
  0x7b   :  { %2262 = vmatprep.subr.bf16.mxu1 %v2261_v10  ;;  %v2659_v10 = vld [vmem:[#allocation6 + $0x248] sm:$0xff]  ;;  %v2271_v31 = vpack.c.bf16 %v2643_v55, %v2641_v27  ;;  %v613_v22 = vadd.f32 %v612_v23, %v250_v11  ;;  %v578_v40 = vrot.slane %v577_v28, 4  ;;  %v1074_v38 = vld [vmem:[#allocation6 + $0x3d0] sm:$0xff]  ;;  %v386_v45 = vadd.f32 %v385_v19, %v2637_v54  ;;  %v1047_v11 = vld [vmem:[#allocation6 + $0x2f8] sm:$0xff] }
  0x7c   :  { %2232 = vmatpush3.bf16.msra.mxu0 %v2231_v25  ;;  %v600_v0 = vadd.f32 %v599_v47, %v249_v39  ;;  %v266_v25 = vld [vmem:[#allocation3 + $0x6b8] sm:$0xff]  ;;  %v2243_v33 = vpack.c.bf16 %v2659_v10, %v2657_v9  ;;  %v591_v41 = vrot.slane %v590_v29, 4  ;;  %v399_v46 = vadd.f32 %v398_v20, %v2639_v59  ;;  %v1058_v58 = vld [vmem:[#allocation6 + $0x350] sm:$0xff]  ;;  %v1044_v59 = vld [vmem:[#allocation6 + $0x2e0] sm:$0xff] }
  0x7d   :  { %2234 = vmatprep.subr.bf16.mxu0 %v2233_v36  ;;  %v2672_v36 = vld [vmem:[#allocation6 + $0x250] sm:$0xff]  ;;  %v282_v39 = vld [vmem:[#allocation3 + $0x738] sm:$0xff]  ;;  %v614_v47 = vadd.f32 %v613_v22, %v266_v25  ;;  %v412_v49 = vadd.f32 %v411_v26, %v410_v61  ;;  %v579_v52 = vadd.f32 %v578_v40, %v577_v28  ;;  %v2275_v55 = vpack.c.bf16 %v1057_v34, %v2664_v24  ;;  %v1077_v9 = vld [vmem:[#allocation6 + $0x3e8] sm:$0xff] }
  0x7e   :  { %2264 = vmatpush3.bf16.msra.mxu1 %v2263_v35  ;;  %v601_v14 = vadd.f32 %v600_v0, %v265_v48  ;;  %v2273_v35 = vpack.c.bf16 %v1073_v16, %v1072_v15  ;;  %v298_v48 = vld [vmem:[#allocation3 + $0x7b8] sm:$0xff]  ;;  %v592_v60 = vadd.f32 %v591_v41, %v590_v29  ;;  %v2245_v56 = vpack.c.bf16 %v1043_v51, %v1042_v50  ;;  %v1046_v10 = vld [vmem:[#allocation6 + $0x2f0] sm:$0xff]  ;;  %v1060_v26 = vld [vmem:[#allocation6 + $0x360] sm:$0xff] }
  0x7f   :  { %2266 = vmatprep.subr.bf16.mxu1 %v2265_v42  ;;  %v615_v53 = vadd.f32 %v614_v47, %v282_v39  ;;  %v2277_v54 = vpack.c.bf16 %v1075_v43, %v1074_v38  ;;  %v580_v0 = vrot.slane %v579_v52, 2  ;;  %v374_v5 = vrot.slane %v373_v44, 1  ;;  %v1061_v28 = vld [vmem:[#allocation6 + $0x368] sm:$0xff]  ;;  %v1030_v22 = vld [vmem:[#allocation6 + $0x270] sm:$0xff] }
  0x80   :  { %2236 = vmatpush3.bf16.msra.mxu0 %v2235_v37  ;;  %v602_v30 = vadd.f32 %v601_v14, %v281_v4  ;;  %v2674_v37 = vld [vmem:[#allocation6 + $0x258] sm:$0xff]  ;;  %v1076_v4 = vld [vmem:[#allocation6 + $0x3e0] sm:$0xff]  ;;  %v387_v6 = vrot.slane %v386_v45, 1  ;;  %v400_v8 = vrot.slane %v399_v46, 1  ;;  %v413_v12 = vrot.slane %v412_v49, 1  ;;  %v1097_v38 = vld [vmem:[#allocation6 + $0x488] sm:$0xff] }
  0x81   :  { %2238 = vmatprep.subr.bf16.mxu0 %v2237_v2  ;;  %v2247_v57 = vpack.c.bf16 %v2674_v37, %v2672_v36  ;;  %v1028_v2 = vld [vmem:[#allocation6 + $0x260] sm:$0xff]  ;;  %v581_v13 = vadd.f32 %v580_v0, %v579_v52  ;;  %v2249_v16 = vpack.c.bf16 %v1045_v63, %v1044_v59  ;;  %v2279_v18 = vpack.c.bf16 %v1059_v62, %v1058_v58  ;;  %v1063_v52 = vld [vmem:[#allocation6 + $0x378] sm:$0xff]  ;;  %v76_v0 = vld [vmem:[#allocation3 + $0xc8] sm:$0xff] }
  0x82   :  { %2268 = vmatpush3.bf16.msra.mxu1 %v2267_v1  ;;  %v603_v42 = vadd.f32 %v602_v30, %v297_v17  ;;  %v593_v1 = vrot.slane %v592_v60, 2  ;;  %v2281_v25 = vpack.c.bf16 %v1077_v9, %v1076_v4  ;;  %v2253_v29 = vpack.c.bf16 %v1047_v11, %v1046_v10  ;;  %v59_v58 = vld [vmem:[#allocation3 + $0x40] sm:$0xff]  ;;  %v62_v59 = vld [vmem:[#allocation3 + $0x58] sm:$0xff]  ;;  %v92_v9 = vld [vmem:[#allocation3 + $0x148] sm:$0xff] }
  0x83   :  { %2270 = vmatprep.subr.bf16.mxu1 %v2269_v7  ;;  %v616_v7 = vadd.f32 %v615_v53, %v298_v48  ;;  %v582_v19 = vrot.slane %v581_v13, 1  ;;  %v388_v34 = vadd.f32 %v387_v6, %v386_v45  ;;  %v401_v50 = vadd.f32 %v400_v8, %v399_v46  ;;  %v1062_v48 = vld [vmem:[#allocation6 + $0x370] sm:$0xff]  ;;  %v60_v53 = vld [vmem:[#allocation3 + $0x48] sm:$0xff]  ;;  %v75_v63 = vld [vmem:[#allocation3 + $0xc0] sm:$0xff] }
  0x84   :  { %2240 = vmatpush3.bf16.msra.mxu0 %v2239_v3  ;;  %v604_v27 = vrot.slane %v603_v42, 4  ;;  %v1029_v3 = vld [vmem:[#allocation6 + $0x268] sm:$0xff]  ;;  %v594_v14 = vadd.f32 %v593_v1, %v592_v60  ;;  %v414_v51 = vadd.f32 %v413_v12, %v412_v49  ;;  %v2283_v41 = vpack.c.bf16 %v1061_v28, %v1060_v26  ;;  %v1128_v49 = vld [vmem:[#allocation6 + $0x580] sm:$0xff]  ;;  %v93_v10 = vld [vmem:[#allocation3 + $0x150] sm:$0xff] }
  0x85   :  { %2242 = vmatprep.subr.bf16.mxu0 %v2241_v32  ;;  %v617_v17 = vrot.slane %v616_v7, 4  ;;  %v2251_v24 = vpack.c.bf16 %v1029_v3, %v1028_v2  ;;  %v1079_v32 = vld [vmem:[#allocation6 + $0x3f8] sm:$0xff]  ;;  %v583_v36 = vadd.f32 %v582_v19, %v581_v13  ;;  %v1129_v60 = vld [vmem:[#allocation6 + $0x588] sm:$0xff]  ;;  %v2287_v62 = vpack.c.bf16 %v1063_v52, %v1062_v48  ;;  %v77_v2 = vld [vmem:[#allocation3 + $0xd0] sm:$0xff] }
  0x86   :  { %2272 = vmatpush3.bf16.msra.mxu1 %v2271_v31  ;;  %v605_v61 = vadd.f32 %v604_v27, %v603_v42  ;;  %v595_v20 = vrot.slane %v594_v14, 1  ;;  %v1078_v31 = vld [vmem:[#allocation6 + $0x3f0] sm:$0xff]  ;;  %v1096_v42 = vld [vmem:[#allocation6 + $0x480] sm:$0xff]  ;;  %v777_v46 = vcombine.low %v401_v50, %v414_v51  ;;  %v78_v3 = vld [vmem:[#allocation3 + $0xd8] sm:$0xff]  ;;  %v428_v6 = vadd.f32 %v76_v0, %v60_v53 }
  0x87   :  { %2274 = vmatprep.subr.bf16.mxu1 %v2273_v35  ;;  %v618_v30 = vadd.f32 %v617_v17, %v616_v7  ;;  %v1031_v35 = vld [vmem:[#allocation6 + $0x278] sm:$0xff]  ;;  %v2285_v43 = vpack.c.bf16 %v1079_v32, %v1078_v31  ;;  %v91_v4 = vld [vmem:[#allocation3 + $0x140] sm:$0xff]  ;;  %v454_v13 = vadd.f32 %v78_v3, %v62_v59  ;;  %v108_v17 = vld [vmem:[#allocation3 + $0x1c8] sm:$0xff] }
  0x88   :  { %2244 = vmatpush3.bf16.msra.mxu0 %v2243_v33  ;;  %v606_v15 = vrot.slane %v605_v61, 2  ;;  %v375_v33 = vadd.f32 %v374_v5, %v373_v44  ;;  %v596_v37 = vadd.f32 %v595_v20, %v594_v14  ;;  %v2255_v44 = vpack.c.bf16 %v1031_v35, %v1030_v22  ;;  %v94_v11 = vld [vmem:[#allocation3 + $0x158] sm:$0xff]  ;;  %v140_v50 = vld [vmem:[#allocation3 + $0x2c8] sm:$0xff]  ;;  %v157_v52 = vld [vmem:[#allocation3 + $0x350] sm:$0xff] }
  0x89   :  { %2246 = vmatprep.subr.bf16.mxu0 %v2245_v56  ;;  %v619_v40 = vrot.slane %v618_v30, 2  ;;  %v415_v5 = vadd.f32 %v75_v63, %v59_v58  ;;  %v791_v7 = vrot.slane %v777_v46, %v2547_v21  ;;  %v429_v20 = vadd.f32 %v428_v6, %v92_v9  ;;  %v126_v31 = vld [vmem:[#allocation3 + $0x258] sm:$0xff]  ;;  %v2687_v58 = vld [vmem:[#allocation6 + $0x400] sm:$0xff]  ;;  %v2689_v53 = vld [vmem:[#allocation6 + $0x408] sm:$0xff] }
  0x8a   :  { %2276 = vmatpush3.bf16.msra.mxu1 %v2275_v55  ;;  %v607_v23 = vadd.f32 %v606_v15, %v605_v61  ;;  %v776_v45 = vcombine.low %v375_v33, %v388_v34  ;;  %v844_v56 = vcombine.low %v583_v36, %v596_v37  ;;  %v2321_v61 = vpack.c.bf16 %v1129_v60, %v1128_v49  ;;  %v139_v34 = vld [vmem:[#allocation3 + $0x2c0] sm:$0xff]  ;;  %v141_v37 = vld [vmem:[#allocation3 + $0x2d0] sm:$0xff]  ;;  %v204_v59 = vld [vmem:[#allocation3 + $0x4c8] sm:$0xff] }
  0x8b   :  { %2278 = vmatprep.subr.bf16.mxu1 %v2277_v54  ;;  %v620_v47 = vadd.f32 %v619_v40, %v618_v30  ;;  %v61_v54 = vld [vmem:[#allocation3 + $0x50] sm:$0xff]  ;;  %v416_v19 = vadd.f32 %v415_v5, %v91_v4  ;;  %v455_v28 = vadd.f32 %v454_v13, %v94_v11  ;;  %v430_v33 = vadd.f32 %v429_v20, %v108_v17  ;;  %v171_v60 = vld [vmem:[#allocation3 + $0x3c0] sm:$0xff]  ;;  %v220_v4 = vld [vmem:[#allocation3 + $0x548] sm:$0xff] }
  0x8c   :  { %2248 = vmatpush3.bf16.msra.mxu0 %v2247_v57  ;;  %v608_v39 = vrot.slane %v607_v23, 1  ;;  %v2289_v57 = vpack.c.bf16 %v1097_v38, %v1096_v42  ;;  %v784_v8 = vrot.slane %v776_v45, %v2547_v21  ;;  %v441_v12 = vadd.f32 %v77_v2, %v61_v54  ;;  %v125_v30 = vld [vmem:[#allocation3 + $0x250] sm:$0xff]  ;;  %v155_v42 = vld [vmem:[#allocation3 + $0x340] sm:$0xff]  ;;  %v156_v38 = vld [vmem:[#allocation3 + $0x348] sm:$0xff] }
  0x8d   :  { %2250 = vmatprep.subr.bf16.mxu0 %v2249_v16  ;;  %v621_v55 = vrot.slane %v620_v47, 1  ;;  %v852_v15 = vrot.slane %v844_v56, %v2547_v21  ;;  %v107_v16 = vld [vmem:[#allocation3 + $0x1c0] sm:$0xff]  ;;  %v172_v54 = vld [vmem:[#allocation3 + $0x3c8] sm:$0xff]  ;;  %v173_v2 = vld [vmem:[#allocation3 + $0x3d0] sm:$0xff] }
  0x8e   :  { %2280 = vmatpush3.bf16.msra.mxu1 %v2279_v18  ;;  %v609_v27 = vadd.f32 %v608_v39, %v607_v23  ;;  %v109_v18 = vld [vmem:[#allocation3 + $0x1d0] sm:$0xff]  ;;  %v110_v23 = vld [vmem:[#allocation3 + $0x1d8] sm:$0xff]  ;;  %v442_v26 = vadd.f32 %v441_v12, %v93_v10  ;;  %v417_v32 = vadd.f32 %v416_v19, %v107_v16  ;;  %v792_v35 = vcombine.low %v784_v8, %v791_v7  ;;  %v187_v45 = vld [vmem:[#allocation3 + $0x440] sm:$0xff] }
  0x8f   :  { %2282 = vmatprep.subr.bf16.mxu1 %v2281_v25  ;;  %v622_v1 = vadd.f32 %v621_v55, %v620_v47  ;;  %v124_v25 = vld [vmem:[#allocation3 + $0x248] sm:$0xff]  ;;  %v456_v22 = vadd.f32 %v455_v28, %v110_v23  ;;  %v142_v39 = vld [vmem:[#allocation3 + $0x2d8] sm:$0xff]  ;;  %v219_v3 = vld [vmem:[#allocation3 + $0x540] sm:$0xff] }
  0x90   :  { %2252 = vmatpush3.bf16.msra.mxu0 %v2251_v24  ;;  %v123_v24 = vld [vmem:[#allocation3 + $0x240] sm:$0xff]  ;;  %v443_v51 = vadd.f32 %v442_v26, %v109_v18  ;;  %v2695_v9 = vld [vmem:[#allocation6 + $0x508] sm:$0xff]  ;;  %v174_v10 = vld [vmem:[#allocation3 + $0x3d8] sm:$0xff] }
  0x91   :  { %2254 = vmatprep.subr.bf16.mxu0 %v2253_v29  ;;  %v845_v14 = vcombine.low %v609_v27, %v622_v1  ;;  %v418_v40 = vadd.f32 %v417_v32, %v123_v24  ;;  %v457_v47 = vadd.f32 %v456_v22, %v126_v31  ;;  %v188_v27 = vld [vmem:[#allocation3 + $0x448] sm:$0xff]  ;;  %v235_v11 = vld [vmem:[#allocation3 + $0x5c0] sm:$0xff]  ;;  %v205_v16 = vld [vmem:[#allocation3 + $0x4d0] sm:$0xff] }
  0x92   :  { %2284 = vmatpush3.bf16.msra.mxu1 %v2283_v41  ;;  %v431_v41 = vadd.f32 %v430_v33, %v124_v25  ;;  %v636_v12 = vadd.f32 %v204_v59, %v188_v27  ;;  %v2700_v23 = vld [vmem:[#allocation6 + $0x498] sm:$0xff]  ;;  %v236_v24 = vld [vmem:[#allocation3 + $0x5c8] sm:$0xff]  ;;  %v251_v25 = vld [vmem:[#allocation3 + $0x640] sm:$0xff] }
  0x93   :  { %2286 = vmatprep.subr.bf16.mxu1 %v2285_v43  ;;  %v859_v29 = vrot.slane %v845_v14, %v2547_v21  ;;  %v444_v43 = vadd.f32 %v443_v51, %v125_v30  ;;  %v419_v46 = vadd.f32 %v418_v40, %v139_v34  ;;  %v458_v56 = vadd.f32 %v457_v47, %v142_v39  ;;  %v2698_v14 = vld [vmem:[#allocation6 + $0x490] sm:$0xff]  ;;  %v2706_v31 = vld [vmem:[#allocation6 + $0x418] sm:$0xff]  ;;  %v2715_v40 = vld [vmem:[#allocation6 + $0x4a0] sm:$0xff] }
  0x94   :  { %2256 = vmatpush3.bf16.msra.mxu0 %v2255_v44  ;;  %v158_v44 = vld [vmem:[#allocation3 + $0x358] sm:$0xff]  ;;  %v432_v49 = vadd.f32 %v431_v41, %v140_v50  ;;  %v637_v28 = vadd.f32 %v636_v12, %v220_v4  ;;  %v2704_v30 = vld [vmem:[#allocation6 + $0x410] sm:$0xff]  ;;  %v2717_v41 = vld [vmem:[#allocation6 + $0x4a8] sm:$0xff] }
  0x95   :  { %2290 = vmatprep.subr.bf16.mxu0 %v2289_v57  ;;  %v860_v36 = vcombine.low %v852_v15, %v859_v29  ;;  %v445_v55 = vadd.f32 %v444_v43, %v141_v37  ;;  %v420_v63 = vadd.f32 %v419_v46, %v155_v42  ;;  %v459_v6 = vadd.f32 %v458_v56, %v158_v44  ;;  %v189_v15 = vld [vmem:[#allocation3 + $0x450] sm:$0xff]  ;;  %v267_v37 = vld [vmem:[#allocation3 + $0x6c0] sm:$0xff]  ;;  %v268_v46 = vld [vmem:[#allocation3 + $0x6c8] sm:$0xff] }
  0x96   :  { %2288 = vmatpush3.bf16.msra.mxu1 %v2287_v62  ;;  %v203_v62 = vld [vmem:[#allocation3 + $0x4c0] sm:$0xff]  ;;  %v433_v0 = vadd.f32 %v432_v49, %v156_v38  ;;  %v2291_v29 = vpack.c.bf16 %v2689_v53, %v2687_v58  ;;  %v2708_v32 = vld [vmem:[#allocation6 + $0x590] sm:$0xff]  ;;  %v649_v39 = vadd.f32 %v205_v16, %v189_v15  ;;  %v2295_v27 = vpack.c.bf16 %v2706_v31, %v2704_v30  ;;  %v2726_v56 = vld [vmem:[#allocation6 + $0x518] sm:$0xff] }
  0x97   :  { %2322 = vmatprep.subr.bf16.mxu1 %v2321_v61  ;;  %v910_v48 = vrot.slane %v860_v36, 7  ;;  %v2692_v61 = vld [vmem:[#allocation6 + $0x500] sm:$0xff]  ;;  %v446_v5 = vadd.f32 %v445_v55, %v157_v52  ;;  %v623_v8 = vadd.f32 %v203_v62, %v187_v45  ;;  %v421_v17 = vadd.f32 %v420_v63, %v171_v60  ;;  %v252_v36 = vld [vmem:[#allocation3 + $0x648] sm:$0xff]  ;;  %v221_v42 = vld [vmem:[#allocation3 + $0x550] sm:$0xff] }
  0x98   :  { %v434_v18 = vadd.f32 %v433_v0, %v172_v54  ;;  %v460_v33 = vadd.f32 %v459_v6, %v174_v10  ;;  %v2323_v22 = vpack.c.bf16 %v2695_v9, %v2692_v61  ;;  %v2293_v45 = vpack.c.bf16 %v2700_v23, %v2698_v14  ;;  %v283_v49 = vld [vmem:[#allocation3 + $0x740] sm:$0xff]  ;;  %v2724_v55 = vld [vmem:[#allocation6 + $0x510] sm:$0xff]  ;;  %v2730_v58 = vld [vmem:[#allocation6 + $0x428] sm:$0xff] }
  0x99   :  { %v911_v57 = vsel %vm900_vm0, %v910_v48, %v792_v35  ;;  %v624_v19 = vadd.f32 %v623_v8, %v219_v3  ;;  %v447_v26 = vadd.f32 %v446_v5, %v173_v2  ;;  %v2713_v35 = vld [vmem:[#allocation6 + $0x598] sm:$0xff]  ;;  %v422_v38 = vrot.slane %v421_v17, 4  ;;  %v237_v62 = vld [vmem:[#allocation3 + $0x5d0] sm:$0xff]  ;;  %v2736_v3 = vld [vmem:[#allocation6 + $0x5a0] sm:$0xff] }
  0x9a   :  { %v912_v1 = vsel %vm902_vm1, %v910_v48, %v911_v57  ;;  %v435_v43 = vrot.slane %v434_v18, 4  ;;  %v2728_v57 = vld [vmem:[#allocation6 + $0x420] sm:$0xff]  ;;  %v190_v53 = vld [vmem:[#allocation3 + $0x458] sm:$0xff]  ;;  %v461_v59 = vrot.slane %v460_v33, 4  ;;  %v2325_v61 = vpack.c.bf16 %v2713_v35, %v2708_v32  ;;  %v284_v4 = vld [vmem:[#allocation3 + $0x748] sm:$0xff] }
  0x9b   :  { %v913_v7 = vsel %vm904_vm2, %v910_v48, %v912_v1  ;;  %v625_v34 = vadd.f32 %v624_v19, %v235_v11  ;;  %v448_v60 = vrot.slane %v447_v26, 4  ;;  %v206_v54 = vld [vmem:[#allocation3 + $0x4d8] sm:$0xff]  ;;  %v2297_v2 = vpack.c.bf16 %v2717_v41, %v2715_v40  ;;  %v299_v5 = vld [vmem:[#allocation3 + $0x7c0] sm:$0xff]  ;;  %v1133_v8 = vld [vmem:[#allocation6 + $0x5a8] sm:$0xff] }
  0x9c   :  { %v914_v13 = vsel %vm906_vm3, %v910_v48, %v913_v7  ;;  %v638_v48 = vadd.f32 %v637_v28, %v236_v24  ;;  %v650_v6 = vadd.f32 %v649_v39, %v221_v42  ;;  %v222_v7 = vld [vmem:[#allocation3 + $0x558] sm:$0xff]  ;;  %v253_v9 = vld [vmem:[#allocation3 + $0x650] sm:$0xff]  ;;  %v2738_v10 = vadd.f32 %v422_v38, %v421_v17  ;;  %v300_v16 = vld [vmem:[#allocation3 + $0x7c8] sm:$0xff] }
  0x9d   :  { %v949_v20 = vmul.f32 0.015625, %v914_v13  ;;  %v626_v47 = vadd.f32 %v625_v34, %v251_v25  ;;  %v2740_v11 = vadd.f32 %v435_v43, %v434_v18  ;;  %v2742_v14 = vld [vmem:[#allocation6 + $0x4b0] sm:$0xff]  ;;  %v2744_v15 = vld [vmem:[#allocation6 + $0x4b8] sm:$0xff]  ;;  %v2746_v19 = vadd.f32 %v448_v60, %v447_v26  ;;  %v1116_v31 = vld [vmem:[#allocation6 + $0x520] sm:$0xff] }
  0x9e   :  { %v639_v0 = vadd.f32 %v638_v48, %v252_v36  ;;  %v662_v23 = vadd.f32 %v206_v54, %v190_v53  ;;  %v238_v24 = vld [vmem:[#allocation3 + $0x5d8] sm:$0xff]  ;;  %v269_v17 = vld [vmem:[#allocation3 + $0x6d0] sm:$0xff]  ;;  %v462_v25 = vadd.f32 %v461_v59, %v460_v33  ;;  %v2299_v30 = vpack.c.bf16 %v2730_v58, %v2728_v57  ;;  %v1117_v32 = vld [vmem:[#allocation6 + $0x528] sm:$0xff] }
  0x9f   :  { %v1243_v50 = vrot.slane %v949_v20, %v2547_v21  ;;  %v1236_v51 = vcombine.high %v949_v20, %v949_v20  ;;  %v627_v63 = vadd.f32 %v626_v47, %v267_v37  ;;  %v651_v20 = vadd.f32 %v650_v6, %v237_v62  ;;  %v2755_v33 = vld [vmem:[#allocation6 + $0x430] sm:$0xff]  ;;  %v254_v35 = vld [vmem:[#allocation3 + $0x658] sm:$0xff]  ;;  %v1088_v59 = vld [vmem:[#allocation6 + $0x440] sm:$0xff] }
  0xa0   :  { %v640_v13 = vadd.f32 %v639_v0, %v268_v46  ;;  %v663_v34 = vadd.f32 %v662_v23, %v222_v7  ;;  %v1087_v39 = vld [vmem:[#allocation6 + $0x438] sm:$0xff]  ;;  %v1134_v40 = vld [vmem:[#allocation6 + $0x5b0] sm:$0xff]  ;;  %v424_v42 = vrot.slane %v2738_v10, 2  ;;  %v437_v38 = vrot.slane %v2740_v11, 2 }
  0xa1   :  { %v1251_v52 = vcombine.high %v1243_v50, %v1243_v50  ;;  %v1250_v44 = vrot.slane %v1236_v51, %v2547_v21  ;;  %v628_v12 = vadd.f32 %v627_v63, %v283_v49  ;;  %v652_v26 = vadd.f32 %v651_v20, %v253_v9  ;;  %v1135_v41 = vld [vmem:[#allocation6 + $0x5b8] sm:$0xff]  ;;  %v2763_v9 = vld [vmem:[#allocation6 + $0x540] sm:$0xff]  ;;  %v1121_v20 = vld [vmem:[#allocation6 + $0x548] sm:$0xff] }
  0xa2   :  { %v641_v28 = vadd.f32 %v640_v13, %v284_v4  ;;  %v2301_v51 = vpack.c.bf16 %v2744_v15, %v2742_v14  ;;  %v664_v47 = vadd.f32 %v663_v34, %v238_v24  ;;  %v270_v48 = vld [vmem:[#allocation3 + $0x6d8] sm:$0xff]  ;;  %v2331_v60 = vpack.c.bf16 %v1117_v32, %v1116_v31  ;;  %v1106_v23 = vld [vmem:[#allocation6 + $0x4d0] sm:$0xff] }
  0xa3   :  { %1507 = vmatprep.mubr.f32.mxu0 %v1251_v52  ;;  %v1252_v1 = vcombine.high %v1250_v44, %v1250_v44  ;;  %v629_v18 = vadd.f32 %v628_v12, %v299_v5  ;;  %v653_v43 = vadd.f32 %v652_v26, %v269_v17  ;;  %v301_v52 = vld [vmem:[#allocation3 + $0x7d0] sm:$0xff]  ;;  %v2303_v53 = vpack.c.bf16 %v1087_v39, %v2755_v33  ;;  %v1119_v62 = vld [vmem:[#allocation6 + $0x538] sm:$0xff] }
  0xa4   :  { %1508 = vmatmul.mubr.f32.vlgmr.msra.gmra.mrb[2].mxu0 %v1243_v50  ;;  %v2329_v50 = vpack.c.bf16 %v1133_v8, %v2736_v3  ;;  %v642_v37 = vadd.f32 %v641_v28, %v300_v16  ;;  %v665_v58 = vadd.f32 %v664_v47, %v254_v35  ;;  %v2333_v54 = vpack.c.bf16 %v1135_v41, %v1134_v40  ;;  %v286_v63 = vld [vmem:[#allocation3 + $0x758] sm:$0xff]  ;;  %v1137_v3 = vld [vmem:[#allocation6 + $0x5c8] sm:$0xff]  ;;  %v2771_v35 = vld [vmem:[#allocation6 + $0x550] sm:$0xff] }
  0xa5   :  { %1577 = vmatprep.mubr.f32.mxu1 %v1252_v1  ;;  %2292 = vmatpush3.bf16.msra.mxu0 %v2291_v29  ;;  %v2327_v29 = vpack.c.bf16 %v2726_v56, %v2724_v55  ;;  %v630_v36 = vrot.slane %v629_v18, 4  ;;  %v1104_v55 = vld [vmem:[#allocation6 + $0x4c0] sm:$0xff]  ;;  %v1105_v56 = vld [vmem:[#allocation6 + $0x4c8] sm:$0xff]  ;;  %v425_v4 = vadd.f32 %v424_v42, %v2738_v10  ;;  %v438_v5 = vadd.f32 %v437_v38, %v2740_v11  ;;  %v302_v12 = vld [vmem:[#allocation3 + $0x7d8] sm:$0xff] }
  0xa6   :  { %1578 = vmatmul.mubr.f32.vlgmr.msra.gmra.mrb[2].mxu1 %v1250_v44  ;;  %2294 = vmatprep.subr.bf16.mxu0 %v2293_v45  ;;  %v450_v44 = vrot.slane %v2746_v19, 2  ;;  %v463_v45 = vrot.slane %v462_v25, 2  ;;  %v643_v49 = vrot.slane %v642_v37, 4  ;;  %v666_v8 = vadd.f32 %v665_v58, %v270_v48  ;;  %v1107_v24 = vld [vmem:[#allocation6 + $0x4d8] sm:$0xff]  ;;  %v1109_v40 = vld [vmem:[#allocation6 + $0x4e8] sm:$0xff]  ;;  %v2775_v41 = vld [vmem:[#allocation6 + $0x460] sm:$0xff] }
  0xa7   :  { %2324 = vmatpush3.bf16.msra.mxu1 %v2323_v22  ;;  %v285_v22 = vld [vmem:[#allocation3 + $0x750] sm:$0xff]  ;;  %v631_v46 = vadd.f32 %v630_v36, %v629_v18  ;;  %v2305_v7 = vpack.c.bf16 %v1105_v56, %v1104_v55  ;;  %v2768_v31 = vld [vmem:[#allocation6 + $0x458] sm:$0xff]  ;;  %v426_v32 = vrot.slane %v425_v4, 1  ;;  %v439_v26 = vrot.slane %v438_v5, 1  ;;  %v1108_v36 = vld [vmem:[#allocation6 + $0x4e0] sm:$0xff] }
  0xa8   :  { %2326 = vmatprep.subr.bf16.mxu1 %v2325_v61  ;;  %v654_v57 = vadd.f32 %v653_v43, %v285_v22  ;;  %v644_v1 = vadd.f32 %v643_v49, %v642_v37  ;;  %v1089_v61 = vld [vmem:[#allocation6 + $0x448] sm:$0xff]  ;;  %v451_v13 = vadd.f32 %v450_v44, %v2746_v19  ;;  %v464_v14 = vadd.f32 %v463_v45, %v462_v25  ;;  %v1138_v19 = vld [vmem:[#allocation6 + $0x5d0] sm:$0xff]  ;;  %v1139_v25 = vld [vmem:[#allocation6 + $0x5d8] sm:$0xff] }
  0xa9   :  { %2296 = vmatpush3.bf16.msra.mxu0 %v2295_v27  ;;  %v1118_v27 = vld [vmem:[#allocation6 + $0x530] sm:$0xff]  ;;  %v632_v0 = vrot.slane %v631_v46, 2  ;;  %v667_v18 = vadd.f32 %v666_v8, %v286_v63  ;;  %v2307_v11 = vpack.c.bf16 %v1089_v61, %v1088_v59  ;;  %v2309_v33 = vpack.c.bf16 %v1107_v24, %v1106_v23  ;;  %v2773_v22 = vld [vmem:[#allocation6 + $0x558] sm:$0xff]  ;;  %v2779_v44 = vld [vmem:[#allocation6 + $0x468] sm:$0xff] }
  0xaa   :  { %2298 = vmatprep.subr.bf16.mxu0 %v2297_v2  ;;  %v1136_v2 = vld [vmem:[#allocation6 + $0x5c0] sm:$0xff]  ;;  %v655_v6 = vadd.f32 %v654_v57, %v301_v52  ;;  %v645_v15 = vrot.slane %v644_v1, 2  ;;  %v2335_v16 = vpack.c.bf16 %v1119_v62, %v1118_v27  ;;  %v452_v37 = vrot.slane %v451_v13, 1  ;;  %v2787_v27 = vld [vmem:[#allocation6 + $0x4f0] sm:$0xff]  ;;  %v2795_v62 = vld [vmem:[#allocation6 + $0x4f8] sm:$0xff] }
  0xab   :  { %2328 = vmatpush3.bf16.msra.mxu1 %v2327_v29  ;;  %v633_v17 = vadd.f32 %v632_v0, %v631_v46  ;;  %v2337_v28 = vpack.c.bf16 %v1137_v3, %v1136_v2  ;;  %v2766_v29 = vld [vmem:[#allocation6 + $0x450] sm:$0xff]  ;;  %v465_v39 = vrot.slane %v464_v14, 1  ;;  %v2341_v52 = vpack.c.bf16 %v1139_v25, %v1138_v19  ;;  %v2781_v45 = vld [vmem:[#allocation6 + $0x5e0] sm:$0xff]  ;;  %v1141_v46 = vld [vmem:[#allocation6 + $0x5e8] sm:$0xff] }
  0xac   :  { %2330 = vmatprep.subr.bf16.mxu1 %v2329_v50  ;;  %v656_v10 = vrot.slane %v655_v6, 4  ;;  %v668_v50 = vadd.f32 %v667_v18, %v302_v12  ;;  %v2311_v48 = vpack.c.bf16 %v2768_v31, %v2766_v29  ;;  %v2783_v49 = vld [vmem:[#allocation6 + $0x560] sm:$0xff]  ;;  %v2789_v55 = vadd.f32 %v426_v32, %v425_v4  ;;  %v2797_v59 = vld [vmem:[#allocation6 + $0x470] sm:$0xff]  ;;  %v2799_v63 = vld [vmem:[#allocation6 + $0x478] sm:$0xff] }
  0xad   :  { %2300 = vmatpush3.bf16.msra.mxu0 %v2299_v30  ;;  %v646_v30 = vadd.f32 %v645_v15, %v644_v1  ;;  %v634_v42 = vrot.slane %v633_v17, 1  ;;  %v2791_v56 = vadd.f32 %v439_v26, %v438_v5  ;;  %v2801_v0 = vadd.f32 %v452_v37, %v451_v13  ;;  %v2805_v61 = vld [vmem:[#allocation6 + $0x5f0] sm:$0xff]  ;;  %v2807_v2 = vld [vmem:[#allocation6 + $0x5f8] sm:$0xff]  ;;  %v63_v8 = vld [vmem:[#allocation3 + $0x60] sm:$0xff] }
  0xae   :  { %2302 = vmatprep.subr.bf16.mxu0 %v2301_v51  ;;  %v657_v34 = vadd.f32 %v656_v10, %v655_v6  ;;  %v2339_v51 = vpack.c.bf16 %v1121_v20, %v2763_v9  ;;  %v669_v47 = vrot.slane %v668_v50, 4  ;;  %v2803_v1 = vadd.f32 %v465_v39, %v464_v14  ;;  %v2818_v13 = vld [vmem:[#allocation6 + $0x570] sm:$0xff]  ;;  %v2820_v14 = vld [vmem:[#allocation6 + $0x578] sm:$0xff]  ;;  %v2822_v15 = vld [vmem:[#allocation6 + $0x680] sm:$0xff] }
  0xaf   :  { %2332 = vmatpush3.bf16.msra.mxu1 %v2331_v60  ;;  %v647_v38 = vrot.slane %v646_v30, 1  ;;  %v2785_v60 = vld [vmem:[#allocation6 + $0x568] sm:$0xff]  ;;  %v2809_v3 = vadd.f32 %v634_v42, %v633_v17  ;;  %v2345_v9 = vpack.c.bf16 %v1141_v46, %v2781_v45  ;;  %v65_v23 = vld [vmem:[#allocation3 + $0x70] sm:$0xff]  ;;  %v66_v24 = vld [vmem:[#allocation3 + $0x78] sm:$0xff]  ;;  %v2317_v17 = vpack.c.bf16 %v2795_v62, %v2787_v27 }
  0xb0   :  { %2334 = vmatprep.subr.bf16.mxu1 %v2333_v54  ;;  %v658_v43 = vrot.slane %v657_v34, 2  ;;  %v670_v58 = vadd.f32 %v669_v47, %v668_v50  ;;  %v2313_v54 = vpack.c.bf16 %v1109_v40, %v1108_v36  ;;  %v2347_v12 = vpack.c.bf16 %v2785_v60, %v2783_v49  ;;  %v64_v20 = vld [vmem:[#allocation3 + $0x68] sm:$0xff]  ;;  %v82_v19 = vld [vmem:[#allocation3 + $0xf8] sm:$0xff]  ;;  %v95_v25 = vld [vmem:[#allocation3 + $0x160] sm:$0xff] }
  0xb1   :  { %2304 = vmatpush3.bf16.msra.mxu0 %v2303_v53  ;;  %v2343_v53 = vpack.c.bf16 %v2773_v22, %v2771_v35  ;;  %v2811_v4 = vadd.f32 %v647_v38, %v646_v30  ;;  %v2319_v10 = vpack.c.bf16 %v2799_v63, %v2797_v59  ;;  %v80_v29 = vld [vmem:[#allocation3 + $0xe8] sm:$0xff]  ;;  %v81_v30 = vld [vmem:[#allocation3 + $0xf0] sm:$0xff]  ;;  %v794_v31 = vcombine.low %v2801_v0, %v2803_v1  ;;  %v1192_v22 = vld [vmem:[#allocation6 + $0x780] sm:$0xff] }
  0xb2   :  { %2306 = vmatprep.subr.bf16.mxu0 %v2305_v7  ;;  %v659_v57 = vadd.f32 %v658_v43, %v657_v34  ;;  %v671_v6 = vrot.slane %v670_v58, 2  ;;  %v2315_v7 = vpack.c.bf16 %v2779_v44, %v2775_v41  ;;  %v96_v32 = vld [vmem:[#allocation3 + $0x168] sm:$0xff]  ;;  %v480_v34 = vadd.f32 %v80_v29, %v64_v20  ;;  %v97_v37 = vld [vmem:[#allocation3 + $0x170] sm:$0xff]  ;;  %v98_v39 = vld [vmem:[#allocation3 + $0x178] sm:$0xff] }
  0xb3   :  { %2336 = vmatpush3.bf16.msra.mxu1 %v2335_v16  ;;  %v2824_v16 = vld [vmem:[#allocation6 + $0x688] sm:$0xff]  ;;  %v493_v50 = vadd.f32 %v81_v30, %v65_v23  ;;  %v861_v35 = vcombine.low %v2809_v3, %v2811_v4  ;;  %v111_v40 = vld [vmem:[#allocation3 + $0x1e0] sm:$0xff]  ;;  %v506_v41 = vadd.f32 %v82_v19, %v66_v24  ;;  %v2349_v42 = vpack.c.bf16 %v2807_v2, %v2805_v61  ;;  %v113_v43 = vld [vmem:[#allocation3 + $0x1f0] sm:$0xff] }
  0xb4   :  { %2338 = vmatprep.subr.bf16.mxu1 %v2337_v28  ;;  %v660_v5 = vrot.slane %v659_v57, 1  ;;  %v672_v18 = vadd.f32 %v671_v6, %v670_v58  ;;  %v79_v28 = vld [vmem:[#allocation3 + $0xe0] sm:$0xff]  ;;  %v1193_v36 = vld [vmem:[#allocation6 + $0x788] sm:$0xff]  ;;  %v114_v47 = vld [vmem:[#allocation3 + $0x1f8] sm:$0xff]  ;;  %v2351_v46 = vpack.c.bf16 %v2820_v14, %v2818_v13  ;;  %v2353_v49 = vpack.c.bf16 %v2824_v16, %v2822_v15 }
  0xb5   :  { %2308 = vmatpush3.bf16.msra.mxu0 %v2307_v11  ;;  %v793_v11 = vcombine.low %v2789_v55, %v2791_v56  ;;  %v467_v26 = vadd.f32 %v79_v28, %v63_v8  ;;  %v112_v38 = vld [vmem:[#allocation3 + $0x1e8] sm:$0xff]  ;;  %v494_v44 = vadd.f32 %v493_v50, %v97_v37  ;;  %v127_v60 = vld [vmem:[#allocation3 + $0x260] sm:$0xff]  ;;  %v129_v55 = vld [vmem:[#allocation3 + $0x270] sm:$0xff]  ;;  %v507_v56 = vadd.f32 %v506_v41, %v98_v39 }
  0xb6   :  { %2310 = vmatprep.subr.bf16.mxu0 %v2309_v33  ;;  %v673_v33 = vrot.slane %v672_v18, 1  ;;  %v128_v27 = vld [vmem:[#allocation3 + $0x268] sm:$0xff]  ;;  %v130_v58 = vld [vmem:[#allocation3 + $0x278] sm:$0xff]  ;;  %v808_v59 = vrot.slane %v794_v31, %v2547_v21  ;;  %v869_v0 = vrot.slane %v861_v35, %v2547_v21  ;;  %v2385_v61 = vpack.c.bf16 %v1193_v36, %v1192_v22  ;;  %v143_v2 = vld [vmem:[#allocation3 + $0x2e0] sm:$0xff] }
  0xb7   :  { %2340 = vmatpush3.bf16.msra.mxu1 %v2339_v51  ;;  %v661_v51 = vadd.f32 %v660_v5, %v659_v57  ;;  %v801_v57 = vrot.slane %v793_v11, %v2547_v21  ;;  %v495_v62 = vadd.f32 %v494_v44, %v113_v43  ;;  %v508_v1 = vadd.f32 %v507_v56, %v114_v47  ;;  %v144_v8 = vld [vmem:[#allocation3 + $0x2e8] sm:$0xff]  ;;  %v191_v14 = vld [vmem:[#allocation3 + $0x460] sm:$0xff]  ;;  %v193_v24 = vld [vmem:[#allocation3 + $0x470] sm:$0xff] }
  0xb8   :  { %2342 = vmatprep.subr.bf16.mxu1 %v2341_v52  ;;  %v481_v52 = vadd.f32 %v480_v34, %v96_v32  ;;  %v674_v45 = vadd.f32 %v673_v33, %v672_v18  ;;  %v192_v15 = vld [vmem:[#allocation3 + $0x468] sm:$0xff]  ;;  %v161_v11 = vld [vmem:[#allocation3 + $0x370] sm:$0xff]  ;;  %v162_v32 = vld [vmem:[#allocation3 + $0x378] sm:$0xff] }
  0xb9   :  { %2312 = vmatpush3.bf16.msra.mxu0 %v2311_v48  ;;  %v468_v48 = vadd.f32 %v467_v26, %v95_v25  ;;  %v496_v5 = vadd.f32 %v495_v62, %v129_v55  ;;  %v509_v13 = vadd.f32 %v508_v1, %v130_v58  ;;  %v809_v16 = vcombine.low %v801_v57, %v808_v59  ;;  %v160_v23 = vld [vmem:[#allocation3 + $0x368] sm:$0xff]  ;;  %v209_v28 = vld [vmem:[#allocation3 + $0x4f0] sm:$0xff]  ;;  %v223_v26 = vld [vmem:[#allocation3 + $0x560] sm:$0xff] }
  0xba   :  { %2314 = vmatprep.subr.bf16.mxu0 %v2313_v54  ;;  %v482_v54 = vadd.f32 %v481_v52, %v112_v38  ;;  %v862_v63 = vcombine.low %v661_v51, %v674_v45  ;;  %v224_v34 = vld [vmem:[#allocation3 + $0x568] sm:$0xff]  ;;  %v701_v51 = vadd.f32 %v209_v28, %v193_v24  ;;  %v225_v33 = vld [vmem:[#allocation3 + $0x570] sm:$0xff]  ;;  %v239_v35 = vld [vmem:[#allocation3 + $0x5e0] sm:$0xff] }
  0xbb   :  { %2344 = vmatpush3.bf16.msra.mxu1 %v2343_v53  ;;  %v469_v53 = vadd.f32 %v468_v48, %v111_v40  ;;  %v240_v22 = vld [vmem:[#allocation3 + $0x5e8] sm:$0xff]  ;;  %v255_v38 = vld [vmem:[#allocation3 + $0x660] sm:$0xff]  ;;  %v2854_v59 = vld [vmem:[#allocation6 + $0x690] sm:$0xff] }
  0xbc   :  { %2346 = vmatprep.subr.bf16.mxu1 %v2345_v9  ;;  %v483_v4 = vadd.f32 %v482_v54, %v128_v27  ;;  %v876_v6 = vrot.slane %v862_v63, %v2547_v21  ;;  %v146_v9 = vld [vmem:[#allocation3 + $0x2f8] sm:$0xff]  ;;  %v256_v43 = vld [vmem:[#allocation3 + $0x668] sm:$0xff]  ;;  %v2849_v45 = vld [vmem:[#allocation6 + $0x600] sm:$0xff]  ;;  %v702_v56 = vadd.f32 %v701_v51, %v225_v33 }
  0xbd   :  { %2316 = vmatpush3.bf16.msra.mxu0 %v2315_v7  ;;  %v470_v3 = vadd.f32 %v469_v53, %v127_v60  ;;  %v145_v7 = vld [vmem:[#allocation3 + $0x2f0] sm:$0xff]  ;;  %v510_v31 = vadd.f32 %v509_v13, %v146_v9  ;;  %v178_v60 = vld [vmem:[#allocation3 + $0x3f8] sm:$0xff]  ;;  %v2852_v58 = vld [vmem:[#allocation6 + $0x608] sm:$0xff] }
  0xbe   :  { %2318 = vmatprep.subr.bf16.mxu0 %v2317_v17  ;;  %v877_v20 = vcombine.low %v869_v0, %v876_v6  ;;  %v207_v17 = vld [vmem:[#allocation3 + $0x4e0] sm:$0xff]  ;;  %v484_v29 = vadd.f32 %v483_v4, %v144_v8  ;;  %v497_v30 = vadd.f32 %v496_v5, %v145_v7  ;;  %v241_v53 = vld [vmem:[#allocation3 + $0x5f0] sm:$0xff]  ;;  %v2856_v63 = vld [vmem:[#allocation6 + $0x698] sm:$0xff]  ;;  %v2355_v24 = vpack.c.bf16 %v2852_v58, %v2849_v45 }
  0xbf   :  { %2348 = vmatpush3.bf16.msra.mxu1 %v2347_v12  ;;  %v159_v12 = vld [vmem:[#allocation3 + $0x360] sm:$0xff]  ;;  %v471_v18 = vadd.f32 %v470_v3, %v143_v2  ;;  %v675_v19 = vadd.f32 %v207_v17, %v191_v14  ;;  %v511_v52 = vadd.f32 %v510_v31, %v162_v32  ;;  %v272_v0 = vld [vmem:[#allocation3 + $0x6e8] sm:$0xff]  ;;  %v2871_v14 = vld [vmem:[#allocation6 + $0x618] sm:$0xff]  ;;  %v2357_v17 = vpack.c.bf16 %v2856_v63, %v2854_v59 }
  0xc0   :  { %2350 = vmatprep.subr.bf16.mxu1 %v2349_v42  ;;  %v917_v25 = vrot.slane %v877_v20, 7  ;;  %v175_v42 = vld [vmem:[#allocation3 + $0x3e0] sm:$0xff]  ;;  %v485_v47 = vadd.f32 %v484_v29, %v160_v23  ;;  %v498_v48 = vadd.f32 %v497_v30, %v161_v11  ;;  %v2860_v4 = vld [vmem:[#allocation6 + $0x708] sm:$0xff]  ;;  %v703_v23 = vadd.f32 %v702_v56, %v241_v53  ;;  %v257_v11 = vld [vmem:[#allocation3 + $0x670] sm:$0xff] }
  0xc1   :  { %2320 = vmatpush3.bf16.msra.mxu0 %v2319_v10  ;;  %v208_v10 = vld [vmem:[#allocation3 + $0x4e8] sm:$0xff]  ;;  %v676_v36 = vadd.f32 %v675_v19, %v223_v26  ;;  %v472_v39 = vadd.f32 %v471_v18, %v159_v12  ;;  %v271_v54 = vld [vmem:[#allocation3 + $0x6e0] sm:$0xff]  ;;  %v2866_v7 = vadd.f32 %v511_v52, %v178_v60  ;;  %v2869_v12 = vld [vmem:[#allocation6 + $0x610] sm:$0xff] }
  0xc2   :  { %2354 = vmatprep.subr.bf16.mxu0 %v2353_v49  ;;  %v688_v50 = vadd.f32 %v208_v10, %v192_v15  ;;  %v918_v37 = vsel %vm900_vm0, %v917_v25, %v809_v16  ;;  %v177_v49 = vld [vmem:[#allocation3 + $0x3f0] sm:$0xff]  ;;  %v2858_v3 = vld [vmem:[#allocation6 + $0x700] sm:$0xff]  ;;  %v288_v16 = vld [vmem:[#allocation3 + $0x768] sm:$0xff]  ;;  %v2359_v52 = vpack.c.bf16 %v2871_v14, %v2869_v12 }
  0xc3   :  { %2352 = vmatpush3.bf16.msra.mxu1 %v2351_v46  ;;  %v919_v41 = vsel %vm902_vm1, %v917_v25, %v918_v37  ;;  %v176_v46 = vld [vmem:[#allocation3 + $0x3e8] sm:$0xff]  ;;  %v677_v27 = vadd.f32 %v676_v36, %v239_v35  ;;  %v473_v1 = vadd.f32 %v472_v39, %v175_v42  ;;  %v287_v5 = vld [vmem:[#allocation3 + $0x760] sm:$0xff]  ;;  %v2864_v8 = vadd.f32 %v498_v48, %v177_v49  ;;  %v2873_v15 = vld [vmem:[#allocation6 + $0x790] sm:$0xff] }
  0xc4   :  { %2386 = vmatprep.subr.bf16.mxu1 %v2385_v61  ;;  %v689_v40 = vadd.f32 %v688_v50, %v224_v34  ;;  %v920_v44 = vsel %vm904_vm2, %v917_v25, %v919_v41  ;;  %v2862_v6 = vadd.f32 %v485_v47, %v176_v46  ;;  %v1195_v18 = vld [vmem:[#allocation6 + $0x798] sm:$0xff]  ;;  %v303_v10 = vld [vmem:[#allocation3 + $0x7e0] sm:$0xff]  ;;  %v2882_v19 = vld [vmem:[#allocation6 + $0x6a8] sm:$0xff]  ;;  %v513_v37 = vrot.slane %v2866_v7, 4 }
  0xc5   :  { %v921_v57 = vsel %vm906_vm3, %v917_v25, %v920_v44  ;;  %v678_v61 = vadd.f32 %v677_v27, %v255_v38  ;;  %v2880_v31 = vld [vmem:[#allocation6 + $0x6a0] sm:$0xff]  ;;  %v304_v25 = vld [vmem:[#allocation3 + $0x7e8] sm:$0xff]  ;;  %v474_v32 = vrot.slane %v473_v1, 4  ;;  %v2884_v34 = vld [vmem:[#allocation6 + $0x710] sm:$0xff]  ;;  %v500_v36 = vrot.slane %v2864_v8, 4 }
  0xc6   :  { %v690_v55 = vadd.f32 %v689_v40, %v240_v22  ;;  %v950_v62 = vmul.f32 0.015625, %v921_v57  ;;  %v2886_v50 = vld [vmem:[#allocation6 + $0x718] sm:$0xff]  ;;  %v273_v35 = vld [vmem:[#allocation3 + $0x6f0] sm:$0xff]  ;;  %v487_v22 = vrot.slane %v2862_v6, 4  ;;  %v2387_v41 = vpack.c.bf16 %v2860_v4, %v2858_v3  ;;  %v2893_v42 = vld [vmem:[#allocation6 + $0x620] sm:$0xff] }
  0xc7   :  { %v679_v20 = vadd.f32 %v678_v61, %v271_v54  ;;  %v194_v51 = vld [vmem:[#allocation3 + $0x478] sm:$0xff]  ;;  %v2895_v38 = vld [vmem:[#allocation6 + $0x628] sm:$0xff]  ;;  %v704_v48 = vadd.f32 %v703_v23, %v257_v11  ;;  %v2389_v44 = vpack.c.bf16 %v1195_v18, %v2873_v15  ;;  %v2361_v45 = vpack.c.bf16 %v2882_v19, %v2880_v31  ;;  %v289_v60 = vld [vmem:[#allocation3 + $0x770] sm:$0xff] }
  0xc8   :  { %v691_v2 = vadd.f32 %v690_v55, %v256_v43  ;;  %v1260_v9 = vrot.slane %v950_v62, %v2547_v21  ;;  %v1253_v13 = vcombine.high %v950_v62, %v950_v62  ;;  %v210_v33 = vld [vmem:[#allocation3 + $0x4f8] sm:$0xff]  ;;  %v2897_v43 = vld [vmem:[#allocation6 + $0x7a0] sm:$0xff]  ;;  %v1197_v46 = vld [vmem:[#allocation6 + $0x7a8] sm:$0xff]  ;;  %v2910_v58 = vadd.f32 %v474_v32, %v473_v1 }
  0xc9   :  { %v680_v26 = vadd.f32 %v679_v20, %v287_v5  ;;  %v226_v49 = vld [vmem:[#allocation3 + $0x578] sm:$0xff]  ;;  %v2904_v55 = vld [vmem:[#allocation6 + $0x720] sm:$0xff]  ;;  %v2906_v56 = vld [vmem:[#allocation6 + $0x728] sm:$0xff]  ;;  %v705_v54 = vadd.f32 %v704_v48, %v273_v35  ;;  %v714_v62 = vadd.f32 %v210_v33, %v194_v51  ;;  %v488_v61 = vadd.f32 %v487_v22, %v2862_v6 }
  0xca   :  { %v692_v28 = vadd.f32 %v691_v2, %v272_v0  ;;  %v1268_v29 = vcombine.high %v1260_v9, %v1260_v9  ;;  %v1267_v30 = vrot.slane %v1253_v13, %v2547_v21  ;;  %v2908_v57 = vld [vmem:[#allocation6 + $0x6b0] sm:$0xff]  ;;  %v1167_v59 = vld [vmem:[#allocation6 + $0x6b8] sm:$0xff]  ;;  %v501_v2 = vadd.f32 %v500_v36, %v2864_v8  ;;  %v1168_v11 = vld [vmem:[#allocation6 + $0x6c0] sm:$0xff] }
  0xcb   :  { %v681_v47 = vadd.f32 %v680_v26, %v303_v10  ;;  %v242_v63 = vld [vmem:[#allocation3 + $0x5f8] sm:$0xff]  ;;  %v305_v0 = vld [vmem:[#allocation3 + $0x7f0] sm:$0xff]  ;;  %v514_v3 = vadd.f32 %v513_v37, %v2866_v7  ;;  %v2391_v1 = vpack.c.bf16 %v2886_v50, %v2884_v34  ;;  %v706_v12 = vadd.f32 %v705_v54, %v289_v60  ;;  %v1152_v22 = vld [vmem:[#allocation6 + $0x640] sm:$0xff] }
  0xcc   :  { %v693_v39 = vadd.f32 %v692_v28, %v288_v16  ;;  %1647 = vmatprep.mubr.f32.mxu0 %v1268_v29  ;;  %v1269_v40 = vcombine.high %v1267_v30, %v1267_v30  ;;  %v2917_v5 = vld [vmem:[#allocation6 + $0x630] sm:$0xff]  ;;  %v715_v14 = vadd.f32 %v714_v62, %v226_v49  ;;  %v2363_v6 = vpack.c.bf16 %v2895_v38, %v2893_v42  ;;  %v1199_v7 = vld [vmem:[#allocation6 + $0x7b8] sm:$0xff]  ;;  %v1169_v29 = vld [vmem:[#allocation6 + $0x6c8] sm:$0xff] }
  0xcd   :  { %1648 = vmatmul.mubr.f32.vlgmr.msra.gmra.mrb[4].mxu0 %v1260_v9  ;;  %v682_v53 = vrot.slane %v681_v47, 4  ;;  %v2919_v9 = vld [vmem:[#allocation6 + $0x638] sm:$0xff]  ;;  %v2393_v8 = vpack.c.bf16 %v1197_v46, %v2897_v43  ;;  %v1198_v15 = vld [vmem:[#allocation6 + $0x7b0] sm:$0xff]  ;;  %v2395_v23 = vpack.c.bf16 %v2906_v56, %v2904_v55  ;;  %v707_v10 = vadd.f32 %v706_v12, %v305_v0  ;;  %v1153_v36 = vld [vmem:[#allocation6 + $0x648] sm:$0xff] }
  0xce   :  { %v694_v27 = vadd.f32 %v693_v39, %v304_v25  ;;  %1717 = vmatprep.mubr.f32.mxu1 %v1269_v40  ;;  %2356 = vmatpush3.bf16.msra.mxu0 %v2355_v24  ;;  %v258_v16 = vld [vmem:[#allocation3 + $0x678] sm:$0xff]  ;;  %v2365_v24 = vpack.c.bf16 %v1167_v59, %v2908_v57  ;;  %v716_v28 = vadd.f32 %v715_v14, %v242_v63  ;;  %v476_v31 = vrot.slane %v2910_v58, 2  ;;  %v1200_v37 = vld [vmem:[#allocation6 + $0x7c0] sm:$0xff]  ;;  %v1201_v42 = vld [vmem:[#allocation6 + $0x7c8] sm:$0xff] }
  0xcf   :  { %1718 = vmatmul.mubr.f32.vlgmr.msra.gmra.mrb[4].mxu1 %v1267_v30  ;;  %2358 = vmatprep.subr.bf16.mxu0 %v2357_v17  ;;  %v683_v13 = vadd.f32 %v682_v53, %v681_v47  ;;  %v2927_v17 = vld [vmem:[#allocation6 + $0x730] sm:$0xff]  ;;  %v2929_v18 = vld [vmem:[#allocation6 + $0x738] sm:$0xff]  ;;  %v489_v19 = vrot.slane %v488_v61, 2  ;;  %v502_v25 = vrot.slane %v501_v2, 2  ;;  %v515_v32 = vrot.slane %v514_v3, 2  ;;  %v1184_v38 = vld [vmem:[#allocation6 + $0x740] sm:$0xff] }
  0xd0   :  { %v695_v4 = vrot.slane %v694_v27, 4  ;;  %2388 = vmatpush3.bf16.msra.mxu1 %v2387_v41  ;;  %v274_v30 = vld [vmem:[#allocation3 + $0x6f8] sm:$0xff]  ;;  %v708_v50 = vrot.slane %v707_v10, 4  ;;  %v717_v51 = vadd.f32 %v716_v28, %v258_v16  ;;  %v2367_v33 = vpack.c.bf16 %v2919_v9, %v2917_v5  ;;  %v1185_v43 = vld [vmem:[#allocation6 + $0x748] sm:$0xff]  ;;  %v1154_v62 = vld [vmem:[#allocation6 + $0x650] sm:$0xff] }
  0xd1   :  { %2390 = vmatprep.subr.bf16.mxu1 %v2389_v44  ;;  %v684_v26 = vrot.slane %v683_v13, 2  ;;  %v2397_v35 = vpack.c.bf16 %v1199_v7, %v1198_v15  ;;  %v290_v39 = vld [vmem:[#allocation3 + $0x778] sm:$0xff]  ;;  %v2399_v40 = vpack.c.bf16 %v2929_v18, %v2927_v17  ;;  %v2369_v41 = vpack.c.bf16 %v1169_v29, %v1168_v11  ;;  %v1202_v63 = vld [vmem:[#allocation6 + $0x7d0] sm:$0xff]  ;;  %v1204_v18 = vld [vmem:[#allocation6 + $0x7e0] sm:$0xff] }
  0xd2   :  { %v696_v20 = vadd.f32 %v695_v4, %v694_v27  ;;  %2360 = vmatpush3.bf16.msra.mxu0 %v2359_v52  ;;  %v709_v47 = vadd.f32 %v708_v50, %v707_v10  ;;  %v718_v48 = vadd.f32 %v717_v51, %v274_v30  ;;  %v1170_v52 = vld [vmem:[#allocation6 + $0x6d0] sm:$0xff]  ;;  %v1171_v44 = vld [vmem:[#allocation6 + $0x6d8] sm:$0xff]  ;;  %v477_v46 = vadd.f32 %v476_v31, %v2910_v58  ;;  %v1205_v11 = vld [vmem:[#allocation6 + $0x7e8] sm:$0xff] }
  0xd3   :  { %2362 = vmatprep.subr.bf16.mxu0 %v2361_v45  ;;  %v306_v45 = vld [vmem:[#allocation3 + $0x7f8] sm:$0xff]  ;;  %v490_v49 = vadd.f32 %v489_v19, %v488_v61  ;;  %v503_v60 = vadd.f32 %v502_v25, %v501_v2  ;;  %v516_v27 = vadd.f32 %v515_v32, %v514_v3  ;;  %v685_v55 = vadd.f32 %v684_v26, %v683_v13  ;;  %v1186_v9 = vld [vmem:[#allocation6 + $0x750] sm:$0xff]  ;;  %v1172_v2 = vld [vmem:[#allocation6 + $0x6e0] sm:$0xff] }
  0xd4   :  { %2392 = vmatpush3.bf16.msra.mxu1 %v2391_v1  ;;  %v697_v34 = vrot.slane %v696_v20, 2  ;;  %v710_v57 = vrot.slane %v709_v47, 2  ;;  %v719_v53 = vadd.f32 %v718_v48, %v290_v39  ;;  %v2401_v54 = vpack.c.bf16 %v1201_v42, %v1200_v37  ;;  %v1155_v59 = vld [vmem:[#allocation6 + $0x658] sm:$0xff]  ;;  %v1173_v3 = vld [vmem:[#allocation6 + $0x6e8] sm:$0xff]  ;;  %v1156_v28 = vld [vmem:[#allocation6 + $0x660] sm:$0xff] }
  0xd5   :  { %2394 = vmatprep.subr.bf16.mxu1 %v2393_v8  ;;  %v2371_v0 = vpack.c.bf16 %v1153_v36, %v1152_v22  ;;  %v2403_v4 = vpack.c.bf16 %v1185_v43, %v1184_v38  ;;  %v2373_v1 = vpack.c.bf16 %v1171_v44, %v1170_v52  ;;  %v1203_v5 = vld [vmem:[#allocation6 + $0x7d8] sm:$0xff]  ;;  %v478_v13 = vrot.slane %v477_v46, 1  ;;  %v1157_v29 = vld [vmem:[#allocation6 + $0x668] sm:$0xff]  ;;  %v1188_v30 = vld [vmem:[#allocation6 + $0x760] sm:$0xff] }
  0xd6   :  { %2364 = vmatpush3.bf16.msra.mxu0 %v2363_v6  ;;  %v698_v56 = vadd.f32 %v697_v34, %v696_v20  ;;  %v1187_v58 = vld [vmem:[#allocation6 + $0x758] sm:$0xff]  ;;  %v720_v61 = vadd.f32 %v719_v53, %v306_v45  ;;  %v491_v12 = vrot.slane %v490_v49, 1  ;;  %v504_v14 = vrot.slane %v503_v60, 1  ;;  %v1189_v26 = vld [vmem:[#allocation6 + $0x768] sm:$0xff]  ;;  %v1174_v34 = vld [vmem:[#allocation6 + $0x6f0] sm:$0xff] }
  0xd7   :  { %2366 = vmatprep.subr.bf16.mxu0 %v2365_v24  ;;  %v517_v6 = vrot.slane %v516_v27, 1  ;;  %v686_v8 = vrot.slane %v685_v55, 1  ;;  %v711_v7 = vadd.f32 %v710_v57, %v709_v47  ;;  %v2405_v20 = vpack.c.bf16 %v1203_v5, %v1202_v63  ;;  %v1175_v50 = vld [vmem:[#allocation6 + $0x6f8] sm:$0xff]  ;;  %v1206_v39 = vld [vmem:[#allocation6 + $0x7f0] sm:$0xff] }
  0xd8   :  { %2396 = vmatpush3.bf16.msra.mxu1 %v2395_v23  ;;  %v699_v15 = vrot.slane %v698_v56, 1  ;;  %v721_v16 = vrot.slane %v720_v61, 4  ;;  %v2375_v23 = vpack.c.bf16 %v1155_v59, %v1154_v62  ;;  %v2407_v24 = vpack.c.bf16 %v1187_v58, %v1186_v9  ;;  %v1158_v43 = vld [vmem:[#allocation6 + $0x670] sm:$0xff]  ;;  %v1159_v47 = vld [vmem:[#allocation6 + $0x678] sm:$0xff] }
  0xd9   :  { %2398 = vmatprep.subr.bf16.mxu1 %v2397_v35  ;;  %v2377_v17 = vpack.c.bf16 %v1173_v3, %v1172_v2  ;;  %v479_v31 = vadd.f32 %v478_v13, %v477_v46  ;;  %v492_v19 = vadd.f32 %v491_v12, %v490_v49  ;;  %v505_v25 = vadd.f32 %v504_v14, %v503_v60  ;;  %v1190_v49 = vld [vmem:[#allocation6 + $0x770] sm:$0xff]  ;;  %v1191_v60 = vld [vmem:[#allocation6 + $0x778] sm:$0xff] }
  0xda   :  { %2368 = vmatpush3.bf16.msra.mxu0 %v2367_v33  ;;  %v722_v10 = vadd.f32 %v721_v16, %v720_v61  ;;  %v518_v32 = vadd.f32 %v517_v6, %v516_v27  ;;  %v687_v51 = vadd.f32 %v686_v8, %v685_v55  ;;  %v700_v33 = vadd.f32 %v699_v15, %v698_v56  ;;  %v1880_v15 = vld [vmem:[%s2964_s2] ss:$0 sm:$0xff]  ;;  %s2502_s2 = smov [#allocation8]  }
  0xdb   :  { %2370 = vmatprep.subr.bf16.mxu0 %v2369_v41  ;;  %v712_v35 = vrot.slane %v711_v7, 1  ;;  %v2409_v36 = vpack.c.bf16 %v1205_v11, %v1204_v18  ;;  %v2379_v37 = vpack.c.bf16 %v1157_v29, %v1156_v28  ;;  %v2411_v42 = vpack.c.bf16 %v1189_v26, %v1188_v30  ;;  %s1870_s12 = sshll.u32 %s2502_s2, 4  ;;  %s1871_s12 = int_to_ptr.vmem [resolvable:$true] %s1870_s12 }
  0xdc   :  { %2400 = vmatpush3.bf16.msra.mxu1 %v2399_v40  ;;  %v723_v22 = vrot.slane %v722_v10, 2  ;;  %v1207_v40 = vld [vmem:[#allocation6 + $0x7f8] sm:$0xff]  ;;  %v2381_v38 = vpack.c.bf16 %v1175_v50, %v1174_v34  ;;  %v810_v48 = vcombine.low %v479_v31, %v492_v19  ;;  %v811_v45 = vcombine.low %v505_v25, %v518_v32  ;;  %s2468_s13 = scalar_lea.vmem %s1871_s12, 32  ;;  %p2473_p3 = scmp.lt.s32.totalorder %s1871_s12, %s1871_s12 }
  0xdd   :  { %2402 = vmatprep.subr.bf16.mxu1 %v2401_v54  ;;  %v713_v52 = vadd.f32 %v712_v35, %v711_v7  ;;  %v878_v46 = vcombine.low %v687_v51, %v700_v33  ;;  %v2413_v27 = vpack.c.bf16 %v1207_v40, %v1206_v39  ;;  %v2383_v55 = vpack.c.bf16 %v1159_v47, %v1158_v43  ;;  %p2469_p2 = scmp.ne.s32.totalorder %s1871_s12, %s2468_s13  ;;  %p2474_p4 = scmp.lt.s32.totalorder %s2468_s13, %s2468_s13 }
  0xde   :  { %2372 = vmatpush3.bf16.msra.mxu0 %v2371_v0  ;;  %v724_v41 = vadd.f32 %v723_v22, %v722_v10  ;;  %v2415_v57 = vpack.c.bf16 %v1191_v60, %v1190_v49  ;;  %v818_v53 = vrot.slane %v810_v48, %v2547_v21  ;;  %v825_v54 = vrot.slane %v811_v45, %v2547_v21 }
  0xdf   :  { %2374 = vmatprep.subr.bf16.mxu0 %v2373_v1  ;;  %v886_v59 = vrot.slane %v878_v46, %v2547_v21  ;;  %p2475_p5 = por %p2474_p4, %p2473_p3 }
  0xe0   :  { %2404 = vmatpush3.bf16.msra.mxu1 %v2403_v4  ;;  %v725_v44 = vrot.slane %v724_v41, 1  ;;  %v826_v0 = vcombine.low %v818_v53, %v825_v54 }
  0xe1   :  { %2406 = vmatprep.subr.bf16.mxu1 %v2405_v20  ;;  %p2476_p6 = pnand %p2475_p5, %p2469_p2 }
  0xe2   :  { %2376 = vmatpush3.bf16.msra.mxu0 %v2375_v23  ;;  %v726_v56 = vadd.f32 %v725_v44, %v724_v41 }
  0xe3   :  { %2378 = vmatprep.subr.bf16.mxu0 %v2377_v17 }
  0xe4   :  { %2408 = vmatpush3.bf16.msra.mxu1 %v2407_v24  ;;  %v879_v62 = vcombine.low %v713_v52, %v726_v56 }
  0xe5   :  { %2410 = vmatprep.subr.bf16.mxu1 %v2409_v36 }
  0xe6   :  { %2380 = vmatpush3.bf16.msra.mxu0 %v2379_v37  ;;  %v893_v63 = vrot.slane %v879_v62, %v2547_v21 }
  0xe7   :  { %2382 = vmatprep.subr.bf16.mxu0 %v2381_v38 }
  0xe8   :  { %2412 = vmatpush3.bf16.msra.mxu1 %v2411_v42  ;;  %v894_v4 = vcombine.low %v886_v59, %v893_v63 }
  0xe9   :  { %2414 = vmatprep.subr.bf16.mxu1 %v2413_v27 }
  0xea   :  { %2384 = vmatpush3.bf16.msra.mxu0 %v2383_v55  ;;  %v924_v1 = vrot.slane %v894_v4, 7 }
  0xec   :  { %2416 = vmatpush3.bf16.msra.mxu1 %v2415_v57  ;;  %v925_v5 = vsel %vm900_vm0, %v924_v1, %v826_v0 }
  0xed   :  { %v926_v9 = vsel %vm902_vm1, %v924_v1, %v925_v5 }
  0xee   :  { %v927_v58 = vsel %vm904_vm2, %v924_v1, %v926_v9 }
  0xef   :  { %v928_v61 = vsel %vm906_vm3, %v924_v1, %v927_v58 }
  0xf0   :  { %v951_v2 = vmul.f32 0.015625, %v928_v61 }
  0xf2   :  { %v1277_v3 = vrot.slane %v951_v2, %v2547_v21  ;;  %v1270_v13 = vcombine.high %v951_v2, %v951_v2 }
  0xf4   :  { %v1285_v12 = vcombine.high %v1277_v3, %v1277_v3  ;;  %v1284_v14 = vrot.slane %v1270_v13, %v2547_v21 }
  0xf6   :  { %1787 = vmatprep.mubr.f32.mxu0 %v1285_v12  ;;  %v1286_v6 = vcombine.high %v1284_v14, %v1284_v14 }
  0xf7   :  { %1788 = vmatmul.mubr.f32.vlgmr.msra.gmra.mrb[6].mxu0 %v1277_v3 }
  0xf8   :  { %1857 = vmatprep.mubr.f32.mxu1 %v1286_v6 }
  0xf9   :  { %1858 = vmatmul.mubr.f32.vlgmr.msra.gmra.mrb[6].mxu1 %v1284_v14 }
 0x14a   :  { %v1913_v8 = vpop.f32.mrb[0].mxu0 }
 0x14b   :  { %v1914_v7 = vpop.f32.mrb[1].mxu0 }
 0x14c   :  { %v1915_v16 = vadd.f32 %v1914_v7, %v1913_v8  ;;  %v1948_v20 = vpop.f32.mrb[0].mxu1 }
 0x14d   :  { %v1949_v23 = vpop.f32.mrb[1].mxu1 }
 0x14e   :  { %v1370_v24 = vadd.f32 %v1915_v16, %v1880_v15  ;;  %v1950_v17 = vadd.f32 %v1949_v23, %v1948_v20 }
 0x150   :  { %v1440_v18 = vadd.f32 %v1950_v17, %v1370_v24 }
 0x177   :  { %v1983_v11 = vpop.f32.mrb[2].mxu0 }
 0x178   :  { %v1984_v10 = vpop.f32.mrb[3].mxu0 }
 0x179   :  { %v1985_v21 = vadd.f32 %v1984_v10, %v1983_v11  ;;  %v2018_v28 = vpop.f32.mrb[2].mxu1 }
 0x17a   :  { %v2019_v29 = vpop.f32.mrb[3].mxu1 }
 0x17b   :  { %v1510_v30 = vadd.f32 %v1985_v21, %v1440_v18  ;;  %v2020_v31 = vadd.f32 %v2019_v29, %v2018_v28 }
 0x17d   :  { %v1580_v19 = vadd.f32 %v2020_v31, %v1510_v30 }
 0x1a0   :  { %v2053_v25 = vpop.f32.mrb[4].mxu0 }
 0x1a1   :  { %v2054_v32 = vpop.f32.mrb[5].mxu0 }
 0x1a2   :  { %v2055_v26 = vadd.f32 %v2054_v32, %v2053_v25  ;;  %v2088_v34 = vpop.f32.mrb[4].mxu1 }
 0x1a3   :  { %v2089_v50 = vpop.f32.mrb[5].mxu1 }
 0x1a4   :  { %v1650_v51 = vadd.f32 %v2055_v26, %v1580_v19  ;;  %v2090_v33 = vadd.f32 %v2089_v50, %v2088_v34 }
 0x1a6   :  { %v1720_v35 = vadd.f32 %v2090_v33, %v1650_v51 }
 0x1ca   :  { %v2123_v22 = vpop.f32.mrb[6].mxu0 }
 0x1cb   :  { %v2124_v36 = vpop.f32.mrb[7].mxu0 }
 0x1cc   :  { %v2125_v37 = vadd.f32 %v2124_v36, %v2123_v22  ;;  %v2158_v39 = vpop.f32.mrb[6].mxu1 }
 0x1cd   :  { %v2159_v40 = vpop.f32.mrb[7].mxu1 }
 0x1ce   :  { %v1790_v41 = vadd.f32 %v2125_v37, %v1720_v35  ;;  %v2160_v42 = vadd.f32 %v2159_v40, %v2158_v39 }
 0x1d0   :  { %v1860_v38 = vadd.f32 %v2160_v42, %v1790_v41 }
 0x1d2   :  { %1863 = vst [vmem:[#allocation8] sm:$0x3] %v1860_v38 }
 0x1d3   :  { %2479 = shalt.err (!%p2476_p6)
}
 0x1d4   :  { %s2480_s16 = scalar_lea.hbm %s2965_s3, 32 }
 0x1d5   :  { %p2481_p7 = scmp.ne.s32.totalorder %s2965_s3, %s2480_s16  ;;  %p2484_p8 = scmp.lt.u32.totalorder %s2480_s16, %s2965_s3 }
 0x1d7   :  { %p2486_p9 = pnand %p2484_p8, %p2481_p7 }
 0x1d9   :  { %2489 = shalt.err (!%p2486_p9)
}
 0x1da   :  { %1873 = dma.vmem_to_hbm [thread:$0]  %s1871_s12, 32, %s2965_s3, [#allocation5]  }
 0x1db   :  { %2494 = dma.done.wait [#allocation5], 32  }
 0x1dc   :  { %2495 = vsyncadd [#allocation5], 4294967264 }
 0x1dd   :  { %1877 = vsyncpa [#allocation4], 1 }
 0x1de   :  { %1878 = vsyncpa [#allocation7], 1 }
 0x1df   :  { %1879 = vsyncpa [#allocation5], 1 }

</bundles_post_ra>
